<compile_context>
chip_gen: v7x
topology: tpu7x:2x2x1
jax: 0.10.0
libtpu: 0.0.40
codegen_flags: <defaults>
</compile_context>

<pallas_src>
import functools

import jax
import jax.numpy as jnp
from jax import lax
from jax.experimental import pallas as pl
from jax.experimental.pallas import tpu as pltpu


def _neck_kernel(img_ref, lbl_ref,
                 w_imgT_ref, w_lbl_ref, b_fc_ref,
                 w_heads_ref, b_heads_ref,
                 mu_ref, lv_ref,
                 acc_ref):
    k = pl.program_id(0)

    @pl.when(k == 0)
    def _():
        acc_ref[...] = jnp.zeros_like(acc_ref)

    # K-tiled chunk of the big image matmul.  Weight tile is lane-dense
    # (latent, tk); contract over the last dim of both operands (trans_b).
    acc_ref[...] += lax.dot_general(
        img_ref[...], w_imgT_ref[...],
        dimension_numbers=(((1,), (1,)), ((), ())),
        preferred_element_type=jnp.float32)

    @pl.when(k == pl.num_programs(0) - 1)
    def _():
        # Finish fc: add the label-embedding contribution + bias, ReLU.
        h = acc_ref[...] + jnp.dot(lbl_ref[...], w_lbl_ref[...],
                                   preferred_element_type=jnp.float32)
        h = jnp.maximum(h + b_fc_ref[...], 0.0)
        # Fused heads: [mu | log_var] in one matmul.
        heads = jnp.dot(h, w_heads_ref[...],
                        preferred_element_type=jnp.float32) + b_heads_ref[...]
        latent = mu_ref.shape[1]
        mu_ref[...] = heads[:, :latent].astype(mu_ref.dtype)
        lv_ref[...] = heads[:, latent:].astype(lv_ref.dtype)


@functools.partial(jax.jit, static_argnames=("tk",))
def linear_neck(encoded_image, encoded_label, params, *, tk=8192):
    """Pallas LinearNeck forward.

    encoded_image: (B, 256*8*8) f32
    encoded_label: (B, label_embedding_dim) f32
    params: dict with
        w_fc_imgT (latent, 16384)   -- image part of fc weight, pre-transposed
        w_fc_lbl  (L, latent)       -- label part of fc weight
        b_fc      (1, latent)
        w_heads   (latent, 2*latent) -- [w_mu | w_lv]
        b_heads   (1, 2*latent)      -- [b_mu | b_lv]
    returns: (mu, log_var), each (B, latent) f32
    """
    B, K_img = encoded_image.shape
    _, L = encoded_label.shape
    latent = params["w_fc_imgT"].shape[0]
    assert K_img % tk == 0, "image feature dim must be divisible by tk"
    n_k = K_img // tk

    grid_spec = pltpu.PrefetchScalarGridSpec(
        num_scalar_prefetch=0,
        grid=(n_k,),
        in_specs=[
            pl.BlockSpec((B, tk), lambda k: (0, k)),            # encoded_image (K-tiled)
            pl.BlockSpec((B, L), lambda k: (0, 0)),             # encoded_label (resident)
            pl.BlockSpec((latent, tk), lambda k: (0, k)),       # w_fc_imgT (K-tiled, lane-dense)
            pl.BlockSpec((L, latent), lambda k: (0, 0)),        # w_fc_lbl (resident)
            pl.BlockSpec((1, latent), lambda k: (0, 0)),        # b_fc (resident)
            pl.BlockSpec((latent, 2 * latent), lambda k: (0, 0)),  # w_heads (resident)
            pl.BlockSpec((1, 2 * latent), lambda k: (0, 0)),    # b_heads (resident)
        ],
        out_specs=[
            pl.BlockSpec((B, latent), lambda k: (0, 0)),        # mu
            pl.BlockSpec((B, latent), lambda k: (0, 0)),        # log_var
        ],
        scratch_shapes=[pltpu.VMEM((B, latent), jnp.float32)],
    )

    mu, log_var = pl.pallas_call(
        _neck_kernel,
        out_shape=(
            jax.ShapeDtypeStruct((B, latent), jnp.float32),
            jax.ShapeDtypeStruct((B, latent), jnp.float32),
        ),
        grid_spec=grid_spec,
        compiler_params=pltpu.CompilerParams(
            dimension_semantics=("arbitrary",),
            # Total VMEM (double-buffered img + w_fc_imgT tiles + residents)
            # is ~3 MiB at tk=8192 — well under every chip's default scoped
            # limit; set an explicit, comfortable cap anyway.
            vmem_limit_bytes=16 * 1024 * 1024,
        ),
    )(
        encoded_image, encoded_label,
        params["w_fc_imgT"], params["w_fc_lbl"], params["b_fc"],
        params["w_heads"], params["b_heads"],
    )
    return mu, log_var


def init_params(key, latent_dim, label_embedding_dim):
    """Deterministic PyTorch-Linear-style init (uniform +/- 1/sqrt(fan_in))."""
    K_img = 256 * 8 * 8
    fan_fc = K_img + label_embedding_dim
    ks = jax.random.split(key, 6)

    def u(k, shape, fan_in):
        bound = 1.0 / jnp.sqrt(jnp.float32(fan_in))
        return jax.random.uniform(k, shape, jnp.float32, -bound, bound)

    # fc weight (math layout (fan_fc, latent)) = concat of image + label parts.
    w_fc = u(ks[0], (fan_fc, latent_dim), fan_fc)
    w_mu = u(ks[2], (latent_dim, latent_dim), latent_dim)
    w_lv = u(ks[4], (latent_dim, latent_dim), latent_dim)
    b_mu = u(ks[3], (1, latent_dim), latent_dim)
    b_lv = u(ks[5], (1, latent_dim), latent_dim)
    return {
        # Pre-transposed image-part weight for a lane-dense streamed tile.
        "w_fc_imgT": jnp.transpose(w_fc[:K_img]),            # (latent, K_img)
        "w_fc_lbl": w_fc[K_img:],                             # (L, latent)
        "b_fc": u(ks[1], (1, latent_dim), fan_fc),
        # Fused heads: [w_mu | w_lv], [b_mu | b_lv].
        "w_heads": jnp.concatenate([w_mu, w_lv], axis=1),     # (latent, 2*latent)
        "b_heads": jnp.concatenate([b_mu, b_lv], axis=1),     # (1, 2*latent)
    }


def _reference(encoded_image, encoded_label, p):
    latent = p["w_fc_imgT"].shape[0]
    x = jnp.concatenate([encoded_image, encoded_label], axis=1)
    w_fc = jnp.concatenate([jnp.transpose(p["w_fc_imgT"]), p["w_fc_lbl"]], axis=0)
    h = jax.nn.relu(x @ w_fc + p["b_fc"])
    mu = h @ p["w_heads"][:, :latent] + p["b_heads"][:, :latent]
    lv = h @ p["w_heads"][:, latent:] + p["b_heads"][:, latent:]
    return mu, lv


if __name__ == "__main__":
    B = 8
    latent_dim = 32
    label_embedding_dim = 32
    K_img = 256 * 8 * 8  # 16384, implied by nn.Linear(256*8*8 + L, latent)

    key = jax.random.PRNGKey(0)
    k_img, k_lbl, k_par = jax.random.split(key, 3)

    encoded_image = jax.random.normal(k_img, (B, K_img), jnp.float32)
    encoded_label = jax.random.normal(k_lbl, (B, label_embedding_dim), jnp.float32)
    params = init_params(k_par, latent_dim, label_embedding_dim)

    mu, log_var = linear_neck(encoded_image, encoded_label, params)
    jax.block_until_ready((mu, log_var))

    mu_ref, lv_ref = _reference(encoded_image, encoded_label, params)
    assert jnp.allclose(mu, mu_ref, atol=1e-4, rtol=1e-4)
    assert jnp.allclose(log_var, lv_ref, atol=1e-4, rtol=1e-4)

    print("KERNEL_OK")
</pallas_src>

<mosaic_0001>
module attributes {stable_mosaic.version = 11 : i64} {
  func.func @_neck_kernel(%arg0: i32, %arg1: memref<8x8192xf32, #tpu.memory_space<vmem>>, %arg2: memref<8x32xf32, #tpu.memory_space<vmem>>, %arg3: memref<32x8192xf32, #tpu.memory_space<vmem>>, %arg4: memref<32x32xf32, #tpu.memory_space<vmem>>, %arg5: memref<1x32xf32, #tpu.memory_space<vmem>>, %arg6: memref<32x64xf32, #tpu.memory_space<vmem>>, %arg7: memref<1x64xf32, #tpu.memory_space<vmem>>, %arg8: memref<8x32xf32, #tpu.memory_space<vmem>>, %arg9: memref<8x32xf32, #tpu.memory_space<vmem>>, %arg10: memref<8x32xf32, #tpu.memory_space<vmem>>) attributes {dimension_semantics = [#tpu.dimension_semantics<arbitrary>], iteration_bounds = array<i64: 2>, scalar_prefetch = 0 : i64, scratch_operands = 1 : i64, tpu.core_type = #tpu.core_type<tc>, window_params = [{transform_indices = @transform_0, window_bounds = array<i64: 8, 8192>}, {pipeline_mode = #tpu.pipeline_mode<synchronous>, transform_indices = @transform_1, window_bounds = array<i64: 8, 32>}, {transform_indices = @transform_2, window_bounds = array<i64: 32, 8192>}, {pipeline_mode = #tpu.pipeline_mode<synchronous>, transform_indices = @transform_3, window_bounds = array<i64: 32, 32>}, {pipeline_mode = #tpu.pipeline_mode<synchronous>, transform_indices = @transform_4, window_bounds = array<i64: 1, 32>}, {pipeline_mode = #tpu.pipeline_mode<synchronous>, transform_indices = @transform_5, window_bounds = array<i64: 32, 64>}, {pipeline_mode = #tpu.pipeline_mode<synchronous>, transform_indices = @transform_6, window_bounds = array<i64: 1, 64>}, {pipeline_mode = #tpu.pipeline_mode<synchronous>, transform_indices = @transform_7, window_bounds = array<i64: 8, 32>}, {pipeline_mode = #tpu.pipeline_mode<synchronous>, transform_indices = @transform_8, window_bounds = array<i64: 8, 32>}]} {
    %c0_i32 = arith.constant 0 : i32
    %0 = arith.cmpi eq, %arg0, %c0_i32 : i32
    %1 = arith.extui %0 : i1 to i32
    %c0_i32_0 = arith.constant 0 : i32
    %2 = arith.cmpi ne, %1, %c0_i32_0 : i32
    scf.if %2 {
      %cst_9 = arith.constant 0.000000e+00 : f32
      %12 = vector.broadcast %cst_9 : f32 to vector<8x32xf32>
      %c0_10 = arith.constant 0 : index
      %c0_11 = arith.constant 0 : index
      %13 = vector.load %arg10[%c0_10, %c0_11] : memref<8x32xf32, #tpu.memory_space<vmem>>, vector<8x32xf32>
      tpu.vector_store %arg10[%c0_10, %c0_11], %12 {strides = array<i32>} : memref<8x32xf32, #tpu.memory_space<vmem>>, vector<8x32xf32>,
    } else {
    }
    %c0 = arith.constant 0 : index
    %c0_1 = arith.constant 0 : index
    %3 = vector.load %arg10[%c0, %c0_1] : memref<8x32xf32, #tpu.memory_space<vmem>>, vector<8x32xf32>
    %c0_2 = arith.constant 0 : index
    %c0_3 = arith.constant 0 : index
    %4 = vector.load %arg1[%c0_2, %c0_3] : memref<8x8192xf32, #tpu.memory_space<vmem>>, vector<8x8192xf32>
    %c0_4 = arith.constant 0 : index
    %c0_5 = arith.constant 0 : index
    %5 = vector.load %arg3[%c0_4, %c0_5] : memref<32x8192xf32, #tpu.memory_space<vmem>>, vector<32x8192xf32>
    %cst = arith.constant dense<0.000000e+00> : vector<8x32xf32>
    %6 = tpu.matmul %4, %5, %cst {dimension_numbers = #tpu.dot_dimension_numbers<[1], [1], [0], [0], [0, 0, 1, 0], [], []>} : vector<8x8192xf32>, vector<32x8192xf32>, vector<8x32xf32> -> vector<8x32xf32>
    %7 = arith.addf %3, %6 : vector<8x32xf32>
    %c0_6 = arith.constant 0 : index
    %c0_7 = arith.constant 0 : index
    %8 = vector.load %arg10[%c0_6, %c0_7] : memref<8x32xf32, #tpu.memory_space<vmem>>, vector<8x32xf32>
    tpu.vector_store %arg10[%c0_6, %c0_7], %7 {strides = array<i32>} : memref<8x32xf32, #tpu.memory_space<vmem>>, vector<8x32xf32>,
    %c1_i32 = arith.constant 1 : i32
    %9 = arith.cmpi eq, %arg0, %c1_i32 : i32
    %10 = arith.extui %9 : i1 to i32
    %c0_i32_8 = arith.constant 0 : i32
    %11 = arith.cmpi ne, %10, %c0_i32_8 : i32
    scf.if %11 {
      %c0_9 = arith.constant 0 : index
      %c0_10 = arith.constant 0 : index
      %12 = vector.load %arg10[%c0_9, %c0_10] : memref<8x32xf32, #tpu.memory_space<vmem>>, vector<8x32xf32>
      %c0_11 = arith.constant 0 : index
      %c0_12 = arith.constant 0 : index
      %13 = vector.load %arg2[%c0_11, %c0_12] : memref<8x32xf32, #tpu.memory_space<vmem>>, vector<8x32xf32>
      %c0_13 = arith.constant 0 : index
      %c0_14 = arith.constant 0 : index
      %14 = vector.load %arg4[%c0_13, %c0_14] : memref<32x32xf32, #tpu.memory_space<vmem>>, vector<32x32xf32>
      %cst_15 = arith.constant dense<0.000000e+00> : vector<8x32xf32>
      %15 = tpu.matmul %13, %14, %cst_15 {dimension_numbers = #tpu.dot_dimension_numbers<[1], [0], [0], [1], [0, 0, 1, 1], [], []>} : vector<8x32xf32>, vector<32x32xf32>, vector<8x32xf32> -> vector<8x32xf32>
      %16 = arith.addf %12, %15 : vector<8x32xf32>
      %c0_16 = arith.constant 0 : index
      %c0_17 = arith.constant 0 : index
      %17 = vector.load %arg5[%c0_16, %c0_17] : memref<1x32xf32, #tpu.memory_space<vmem>>, vector<1x32xf32>
      %18 = vector.broadcast %17 : vector<1x32xf32> to vector<8x32xf32>
      %19 = arith.addf %16, %18 : vector<8x32xf32>
      %cst_18 = arith.constant 0.000000e+00 : f32
      %20 = vector.broadcast %cst_18 : f32 to vector<8x32xf32>
      %21 = arith.maximumf %19, %20 : vector<8x32xf32>
      %c0_19 = arith.constant 0 : index
      %c0_20 = arith.constant 0 : index
      %22 = vector.load %arg6[%c0_19, %c0_20] : memref<32x64xf32, #tpu.memory_space<vmem>>, vector<32x64xf32>
      %cst_21 = arith.constant dense<0.000000e+00> : vector<8x64xf32>
      %23 = tpu.matmul %21, %22, %cst_21 {dimension_numbers = #tpu.dot_dimension_numbers<[1], [0], [0], [1], [0, 0, 1, 1], [], []>} : vector<8x32xf32>, vector<32x64xf32>, vector<8x64xf32> -> vector<8x64xf32>
      %c0_22 = arith.constant 0 : index
      %c0_23 = arith.constant 0 : index
      %24 = vector.load %arg7[%c0_22, %c0_23] : memref<1x64xf32, #tpu.memory_space<vmem>>, vector<1x64xf32>
      %25 = vector.broadcast %24 : vector<1x64xf32> to vector<8x64xf32>
      %26 = arith.addf %23, %25 : vector<8x64xf32>
      %27 = vector.extract_strided_slice %26 {offsets = [0, 0], sizes = [8, 32], strides = [1, 1]} : vector<8x64xf32> to vector<8x32xf32>
      %c0_24 = arith.constant 0 : index
      %c0_25 = arith.constant 0 : index
      %28 = vector.load %arg8[%c0_24, %c0_25] : memref<8x32xf32, #tpu.memory_space<vmem>>, vector<8x32xf32>
      tpu.vector_store %arg8[%c0_24, %c0_25], %27 {strides = array<i32>} : memref<8x32xf32, #tpu.memory_space<vmem>>, vector<8x32xf32>,
      %29 = vector.extract_strided_slice %26 {offsets = [0, 32], sizes = [8, 32], strides = [1, 1]} : vector<8x64xf32> to vector<8x32xf32>
      %c0_26 = arith.constant 0 : index
      %c0_27 = arith.constant 0 : index
      %30 = vector.load %arg9[%c0_26, %c0_27] : memref<8x32xf32, #tpu.memory_space<vmem>>, vector<8x32xf32>
      tpu.vector_store %arg9[%c0_26, %c0_27], %29 {strides = array<i32>} : memref<8x32xf32, #tpu.memory_space<vmem>>, vector<8x32xf32>,
    } else {
    }
    return
  }
  func.func @transform_0(%arg0: i32) -> (i32, i32) {
    %c0_i32 = arith.constant 0 : i32
    %c0_i32_0 = arith.constant 0 : i32
    return %c0_i32, %arg0 : i32, i32
  }
  func.func @transform_1(%arg0: i32) -> (i32, i32) {
    %c0_i32 = arith.constant 0 : i32
    %c0_i32_0 = arith.constant 0 : i32
    %c0_i32_1 = arith.constant 0 : i32
    return %c0_i32, %c0_i32_0 : i32, i32
  }
  func.func @transform_2(%arg0: i32) -> (i32, i32) {
    %c0_i32 = arith.constant 0 : i32
    %c0_i32_0 = arith.constant 0 : i32
    return %c0_i32, %arg0 : i32, i32
  }
  func.func @transform_3(%arg0: i32) -> (i32, i32) {
    %c0_i32 = arith.constant 0 : i32
    %c0_i32_0 = arith.constant 0 : i32
    %c0_i32_1 = arith.constant 0 : i32
    return %c0_i32, %c0_i32_0 : i32, i32
  }
  func.func @transform_4(%arg0: i32) -> (i32, i32) {
    %c0_i32 = arith.constant 0 : i32
    %c0_i32_0 = arith.constant 0 : i32
    %c0_i32_1 = arith.constant 0 : i32
    return %c0_i32, %c0_i32_0 : i32, i32
  }
  func.func @transform_5(%arg0: i32) -> (i32, i32) {
    %c0_i32 = arith.constant 0 : i32
    %c0_i32_0 = arith.constant 0 : i32
    %c0_i32_1 = arith.constant 0 : i32
    return %c0_i32, %c0_i32_0 : i32, i32
  }
  func.func @transform_6(%arg0: i32) -> (i32, i32) {
    %c0_i32 = arith.constant 0 : i32
    %c0_i32_0 = arith.constant 0 : i32
    %c0_i32_1 = arith.constant 0 : i32
    return %c0_i32, %c0_i32_0 : i32, i32
  }
  func.func @transform_7(%arg0: i32) -> (i32, i32) {
    %c0_i32 = arith.constant 0 : i32
    %c0_i32_0 = arith.constant 0 : i32
    %c0_i32_1 = arith.constant 0 : i32
    return %c0_i32, %c0_i32_0 : i32, i32
  }
  func.func @transform_8(%arg0: i32) -> (i32, i32) {
    %c0_i32 = arith.constant 0 : i32
    %c0_i32_0 = arith.constant 0 : i32
    %c0_i32_1 = arith.constant 0 : i32
    return %c0_i32, %c0_i32_0 : i32, i32
  }
}

</mosaic_0001>

<bundles_post_ra>
// kernel: linear_neck.1
= control target key start
LH: loop header
LB: loop body
LE: loop exit
PB: predicated region body
PF: predicated region fallthrough
CT: control target
= control target key end

     0   :  { %s4808_s0 = inlined_call_operand.hbm [shape: f32[8,16384], index: 0, kind: input, shape index: {}]   ;;  %s4809_s1 = inlined_call_operand.hbm [shape: f32[8,32], index: 1, kind: input, shape index: {}]   ;;  %s4810_s2 = inlined_call_operand.hbm [shape: f32[32,16384], index: 2, kind: input, shape index: {}]   ;;  %s4811_s3 = inlined_call_operand.hbm [shape: f32[32,32], index: 3, kind: input, shape index: {}]   ;;  %s4812_s4 = inlined_call_operand.hbm [shape: f32[1,32], index: 4, kind: input, shape index: {}]   ;;  %s4813_s5 = inlined_call_operand.hbm [shape: f32[32,64], index: 5, kind: input, shape index: {}]   ;;  %s4814_s6 = inlined_call_operand.hbm [shape: f32[1,64], index: 6, kind: input, shape index: {}]   ;;  %s4815_s7 = inlined_call_operand.hbm [shape: f32[8,32], index: 7, kind: output, shape index: {0}]   ;;  %s4816_s8 = inlined_call_operand.hbm [shape: f32[8,32], index: 8, kind: output, shape index: {1}]  }
   0x1   :  { %4829 = sst [smem:[#allocation29_spill]] %s4808_s0 }
   0x2   :  { %4830 = sst [smem:[#allocation30_spill]] %s4809_s1 }
   0x3   :  { %4831 = sst [smem:[#allocation31_spill]] %s4812_s4 }
   0x4   :  { %4832 = sst [smem:[#allocation32_spill]] %s4816_s8 }
   0x5   :  { %14 = vsyncpa [#allocation4], 0 }
   0x6   :  { %16 = vsyncpa [#allocation4 + $0x1], 0 }
   0x7   :  { %17 = vsyncpa [#allocation7], 0 }
   0x8   :  { %18 = vsyncpa [#allocation11], 0 }
   0x9   :  { %19 = vsyncpa [#allocation14], 0 }
   0xa   :  { %20 = vsyncpa [#allocation5], 0 }
   0xb   :  { %21 = vsyncpa [#allocation17], 0  ;;  %s4150_s27 = smov 0   ;;  %s4152_s28 = smov 0  }
   0xc   :  { %s4154_s29 = smov 0   ;;  %s4156_s30 = smov 0  }
   0xd LB: > { %4833 = sst [smem:[#allocation26_spill]] %s4080_s29  ;;  %s4086_s9 = smov [#allocation6]   ;;  %s4084_s30 = sphi %s4156_s30, %s4861_s30   ;;  %s4080_s29 = sphi %s4154_s29, %s4863_s29   ;;  %s4076_s28 = sphi %s4152_s28, %s4865_s28   ;;  %s4072_s27 = sphi %s4150_s27, %s4864_s27  }
   0xe   : > { %s244_s10 = sshll.u32 %s4086_s9, 4  ;;  %s4171_s11 = sadd.s32 4294967295, %s4084_s30   ;;  %s245_s10 = int_to_ptr.vmem [resolvable:$true] %s244_s10 }
   0xf   : > { %p3316_p0 = scmp.ge.s32.totalorder %s4084_s30, 1  ;;  %p4817_p1 = scmp.eq.s32.totalorder %s4171_s11, 0 }
  0x10   : > { %p231_p2 = scmp.lt.s32.totalorder %s4084_s30, 3  ;;  %s4087_s13 = smov [#allocation10]  }
  0x11   : > { %s268_s14 = sshll.u32 %s4087_s13, 4  ;;  %s4836_s1 = sld [smem:[#allocation30_spill]]  ;;  %s4183_s14 = int_to_ptr.vmem [resolvable:$true] %s268_s14 }
  0x12   : > { %p4177_p4 = pnand %p3316_p0, %p231_p2 }
  0x14   : > { %s4834_s12 = scalar_select %p4177_p4, 1, 0 }
  0x15   : > { %p3683_p5 = pneg %p4177_p4 }
  0x17   : > { %p4187_p6 = pnand %p3683_p5, %p4817_p1  ;;  %s3770_s18 = scalar_lea.hbm %s4836_s1, 128 }
  0x18   : > { %p3771_p7 = scmp.ne.s32.totalorder %s4836_s1, %s3770_s18  ;;  %p3777_p11 = scmp.lt.u32.totalorder %s3770_s18, %s4836_s1 }
  0x19   : > { %s4835_s15 = scalar_select %p4187_p6, 1, 0 }
  0x1a   : > { %p4199_p8 = pneg %p4187_p6 }
  0x1c   : > { %p3773_p9 = pnand %p4199_p8, %p3771_p7 }
  0x1e   : > { %p3774_p10 = pneg %p3773_p9 }
  0x20   : > { %p3779_p12 = pnand %p3777_p11, %p3774_p10 }
  0x22   : > { %3782 = shalt.err (!%p3779_p12)
}
  0x23   : > { %s3783_s24 = scalar_lea.vmem %s245_s10, 128  ;;  %p3791_p5 = scmp.lt.s32.totalorder %s245_s10, %s245_s10 }
  0x24   : > { %p3784_p13 = scmp.ne.s32.totalorder %s245_s10, %s3783_s24  ;;  %p3792_p3 = scmp.lt.s32.totalorder %s3783_s24, %s3783_s24 }
  0x26   : > { %p3786_p0 = pnand %p3784_p13, %p4199_p8  ;;  %p3793_p1 = por %p3792_p3, %p3791_p5 }
  0x28   : > { %p3787_p2 = pneg %p3786_p0 }
  0x2a   : > { %p3794_p4 = pnand %p3793_p1, %p3787_p2 }
  0x2c   : > { %3797 = shalt.err (!%p3794_p4)
}
  0x2d   : > { %3686 = dma.hbm_to_vmem [thread:$0]  (!%p4187_p6), %s4836_s1, 128, %s245_s10, [#allocation7]  }
  0x2e   : > { %s4838_s4 = sld [smem:[#allocation31_spill]] }
  0x34   : > { %s3798_s16 = scalar_lea.hbm %s4838_s4, 16 }
  0x35   : > { %p3799_p7 = scmp.ne.s32.totalorder %s4838_s4, %s3798_s16  ;;  %p3805_p1 = scmp.lt.u32.totalorder %s3798_s16, %s4838_s4 }
  0x37   : > { %p3801_p9 = pnand %p3799_p7, %p4199_p8 }
  0x39   : > { %p3802_p3 = pneg %p3801_p9 }
  0x3b   : > { %p3807_p4 = pnand %p3805_p1, %p3802_p3 }
  0x3d   : > { %3810 = shalt.err (!%p3807_p4)
}
  0x3e   : > { %s3811_s10 = scalar_lea.vmem %s4183_s14, 16  ;;  %s3818_s22 = scalar_lea.vmem %s4183_s14, 32 }
  0x3f   : > { %p3812_p10 = scmp.ne.s32.totalorder %s4183_s14, %s3811_s10  ;;  %p3819_p13 = scmp.lt.s32.totalorder %s4183_s14, %s4183_s14 }
  0x40   : > { %p3820_p0 = scmp.lt.s32.totalorder %s3818_s22, %s3811_s10 }
  0x41   : > { %p3814_p11 = pnand %p3812_p10, %p4199_p8 }
  0x42   : > { %p3821_p2 = por %p3820_p0, %p3819_p13 }
  0x43   : > { %p3815_p12 = pneg %p3814_p11 }
  0x45   : > { %p3822_p5 = pnand %p3821_p2, %p3815_p12 }
  0x47   : > { %3825 = shalt.err (!%p3822_p5)
}
  0x48   : > { %3692 = dma.hbm_to_vmem [thread:$0]  (!%p4187_p6), %s4838_s4, 16, %s4183_s14, [#allocation11]  }
  0x49   : > { %s4240_s25 = sadd.s32 1, %s4084_s30   ;;  %s34_s26 = sadd.s32 1, %s4080_s29 }
  0x4a   : > { %4839 = sst [smem:[#allocation27_spill]] %s4240_s25  ;;  %s31_s9 = ssub.s32 %s4084_s30, %s4240_s25 }
  0x4b   : > { %p41_p7 = scmp.ne.s32.totalorder %s4080_s29, %s4076_s28  ;;  %p32_p9 = scmp.eq.s32.totalorder %s31_s9, 0 }
  0x4c   : > { %p42_p3 = scmp.eq.s32.totalorder %s4084_s30, 0  ;;  %p47_p1 = scmp.ne.s32.totalorder %s4076_s28, %s4072_s27 }
  0x4d   : > { %p3711_p4 = scmp.lt.s32.totalorder %s4084_s30, 2  ;;  %p4841_p11 = scmp.eq.s32.totalorder %s4171_s11, 0 }
  0x4e   : > { %s4252_s13 = scalar_select %p32_p9, %s4080_s29, %s34_s26  }
  0x4f   : > { %p43_p10 = por %p42_p3, %p41_p7  ;;  %p4256_p12 = por %p4841_p11, %p47_p1 }
  0x50   : > { %4840 = sst [smem:[#allocation28_spill]] %s4252_s13  ;;  %s303_s17 = sand.u32 1, %s4084_s30  }
  0x51   : > { %s4842_s16 = scalar_select %p4256_p12, 1, 0 }
  0x52   : > { %s305_s14 = sand.u32 1, %s4080_s29   ;;  %s3349_s19 = sshll.u32 %s4084_s30, 13 }
  0x53   : > { %s3323_s18 = sshll.u32 %s305_s14, 9  ;;  %s4843_s0 = sld [smem:[#allocation29_spill]] }
  0x54   : > { %s307_s27 = scalar_lea.vmem [#allocation3], %s3323_s18  ;;  %p4270_p13 = pnand %p3711_p4, %p43_p10 }
  0x55   : > { %s315_s23 = sshll.u32 %s307_s27, 4  ;;  %s4274_s30 = sshll.u32 %s305_s14, 11  ;;  %s4268_s23 = int_to_ptr.vmem [resolvable:$true] %s315_s23 }
  0x56   : > { %s4844_s24 = scalar_select %p4270_p13, 1, 0 }
  0x57   : > { %s4279_s20 = scalar_lea.hbm %s4810_s2, %s3349_s19  ;;  %s4281_s10 = scalar_lea.sflag [#allocation4], %s303_s17 }
  0x58   : > { %p4822_p2 = pneg %p4270_p13 }
  0x59   : > { %s4266_s22 = scalar_lea.hbm %s4843_s0, %s3349_s19  ;;  %s3831_s14 = scalar_lea.hbm %s4843_s0, 16384 }
  0x5a   : > { %s3826_s18 = scalar_lea.hbm %s4266_s22, 8192  ;;  %p3832_p9 = scmp.lt.u32.totalorder %s4266_s22, %s4843_s0 }
  0x5b   : > { %p3827_p0 = scmp.ne.s32.totalorder %s4266_s22, %s3826_s18  ;;  %p3833_p3 = scmp.lt.u32.totalorder %s3831_s14, %s3826_s18 }
  0x5c   : > { %p3835_p4 = scmp.lt.u32.totalorder %s3826_s18, %s4266_s22 }
  0x5d   : > { %p3829_p5 = pnand %p4822_p2, %p3827_p0  ;;  %p3834_p1 = por %p3833_p3, %p3832_p9 }
  0x5f   : > { %p3830_p7 = pneg %p3829_p5  ;;  %p3836_p10 = por %p3835_p4, %p3834_p1 }
  0x61   : > { %p3837_p11 = pnand %p3836_p10, %p3830_p7 }
  0x63   : > { %3840 = shalt.err (!%p3837_p11)
}
  0x64   : > { %s3841_s17 = scalar_lea.vmem %s4268_s23, 8192  ;;  %s4088_s1 = smov [#allocation3]  }
  0x65   : > { %p3842_p0 = scmp.ne.s32.totalorder %s4268_s23, %s3841_s17  ;;  %s3846_s19 = sshll.u32 %s4088_s1, 4  ;;  %s3847_s19 = int_to_ptr.vmem [resolvable:$false] %s3846_s19 }
  0x66   : > { %s3848_s4 = scalar_lea.vmem %s3847_s19, 16384  ;;  %p3849_p6 = scmp.lt.s32.totalorder %s4268_s23, %s3847_s19 }
  0x67   : > { %p3844_p5 = pnand %p3842_p0, %p4822_p2  ;;  %p3850_p9 = scmp.lt.s32.totalorder %s3848_s4, %s3841_s17 }
  0x69   : > { %p3845_p12 = pneg %p3844_p5  ;;  %p3851_p3 = por %p3850_p9, %p3849_p6 }
  0x6b   : > { %p3852_p1 = pnand %p3851_p3, %p3845_p12 }
  0x6d   : > { %3855 = shalt.err (!%p3852_p1)
}
  0x6e   : > { %3702 = dma.hbm_to_vmem [thread:$0]  (!%p4270_p13), %s4266_s22, 8192, %s4268_s23, %s4281_s10  }
  0x6f   : > { %s326_s13 = scalar_lea.vmem [#allocation8], %s4274_s30  ;;  %s4089_s9 = smov [#allocation9]  }
  0x70   : > { %s333_s26 = sshll.u32 %s326_s13, 4  ;;  %s254_s18 = sshll.u32 %s4089_s9, 4  ;;  %s4310_s26 = int_to_ptr.vmem [resolvable:$true] %s333_s26  ;;  %s255_s18 = int_to_ptr.vmem [resolvable:$true] %s254_s18 }
  0x71   : > { %s3856_s17 = scalar_lea.hbm %s4811_s3, 512 }
  0x72   : > { %p3857_p6 = scmp.ne.s32.totalorder %s4811_s3, %s3856_s17  ;;  %p3863_p4 = scmp.lt.u32.totalorder %s3856_s17, %s4811_s3 }
  0x74   : > { %p3859_p12 = pnand %p3857_p6, %p4199_p8 }
  0x76   : > { %p3860_p7 = pneg %p3859_p12 }
  0x78   : > { %p3865_p10 = pnand %p3863_p4, %p3860_p7 }
  0x7a   : > { %3868 = shalt.err (!%p3865_p10)
}
  0x7b   : > { %s3869_s23 = scalar_lea.vmem %s255_s18, 512  ;;  %p3877_p9 = scmp.lt.s32.totalorder %s255_s18, %s255_s18 }
  0x7c   : > { %p3870_p11 = scmp.ne.s32.totalorder %s255_s18, %s3869_s23  ;;  %p3878_p3 = scmp.lt.s32.totalorder %s3869_s23, %s3869_s23 }
  0x7e   : > { %p3872_p0 = pnand %p3870_p11, %p4199_p8  ;;  %p3879_p1 = por %p3878_p3, %p3877_p9 }
  0x80   : > { %p3873_p5 = pneg %p3872_p0 }
  0x82   : > { %p3880_p2 = pnand %p3879_p1, %p3873_p5 }
  0x84   : > { %3883 = shalt.err (!%p3880_p2)
}
  0x85   : > { %s4090_s30 = smov 128   ;;  %s4091_s13 = smov 8  }
  0x86   : > { %p4845_p6 = scmp.ne.s32.totalorder %s4835_s15, 0  ;;  %s4092_s14 = smov [#allocation12]  }
  0x87   : > { %s278_s17 = sshll.u32 %s4092_s14, 4  ;;  %s4093_s1 = smov [#allocation13]   ;;  %s279_s17 = int_to_ptr.vmem [resolvable:$true] %s278_s17 }
  0x88   : > { %3689 = dma.hbm_to_vmem [thread:$0]  (!%p4845_p6), %s4811_s3, 512, %s255_s18, [#allocation7], %s4090_s30, %s4090_s30, %s4091_s13  }
  0x89   : > { %s292_s19 = sshll.u32 %s4093_s1, 4  ;;  %s3884_s23 = scalar_lea.hbm %s4813_s5, 512  ;;  %s293_s19 = int_to_ptr.vmem [resolvable:$true] %s292_s19 }
  0x8a   : > { %p3885_p2 = scmp.ne.s32.totalorder %s4813_s5, %s3884_s23  ;;  %p3891_p4 = scmp.lt.u32.totalorder %s3884_s23, %s4813_s5 }
  0x8c   : > { %p3887_p12 = pnand %p3885_p2, %p4199_p8 }
  0x8e   : > { %p3888_p7 = pneg %p3887_p12 }
  0x90   : > { %p3893_p10 = pnand %p3891_p4, %p3888_p7 }
  0x92   : > { %3896 = shalt.err (!%p3893_p10)
}
  0x93   : > { %s3897_s18 = scalar_lea.vmem %s279_s17, 512  ;;  %p3905_p9 = scmp.lt.s32.totalorder %s279_s17, %s279_s17 }
  0x94   : > { %p3898_p11 = scmp.ne.s32.totalorder %s279_s17, %s3897_s18  ;;  %p3906_p3 = scmp.lt.s32.totalorder %s3897_s18, %s3897_s18 }
  0x96   : > { %p3900_p0 = pnand %p3898_p11, %p4199_p8  ;;  %p3907_p1 = por %p3906_p3, %p3905_p9 }
  0x98   : > { %p3901_p5 = pneg %p3900_p0 }
  0x9a   : > { %p3908_p13 = pnand %p3907_p1, %p3901_p5 }
  0x9c   : > { %3911 = shalt.err (!%p3908_p13)
}
  0x9d   : > { %3695 = dma.hbm_to_vmem [thread:$0]  (!%p4845_p6), %s4813_s5, 512, %s279_s17, [#allocation11], %s4090_s30, %s4090_s30, %s4091_s13  }
  0x9e   : > { %s3912_s9 = scalar_lea.hbm %s4814_s6, 16 }
  0x9f   : > { %p3913_p2 = scmp.ne.s32.totalorder %s4814_s6, %s3912_s9  ;;  %p3919_p13 = scmp.lt.u32.totalorder %s3912_s9, %s4814_s6 }
  0xa1   : > { %p3915_p12 = pnand %p3913_p2, %p4199_p8 }
  0xa3   : > { %p3916_p7 = pneg %p3915_p12 }
  0xa5   : > { %p3921_p4 = pnand %p3919_p13, %p3916_p7 }
  0xa7   : > { %3924 = shalt.err (!%p3921_p4)
}
  0xa8   : > { %s3925_s22 = scalar_lea.vmem %s293_s19, 16  ;;  %s3932_s30 = scalar_lea.vmem %s293_s19, 32 }
  0xa9   : > { %p3926_p10 = scmp.ne.s32.totalorder %s293_s19, %s3925_s22  ;;  %p3933_p5 = scmp.lt.s32.totalorder %s293_s19, %s293_s19 }
  0xaa   : > { %p3934_p9 = scmp.lt.s32.totalorder %s3932_s30, %s3925_s22 }
  0xab   : > { %p3928_p11 = pnand %p3926_p10, %p4199_p8 }
  0xac   : > { %p3935_p3 = por %p3934_p9, %p3933_p5 }
  0xad   : > { %p3929_p0 = pneg %p3928_p11 }
  0xaf   : > { %p3936_p1 = pnand %p3935_p3, %p3929_p0 }
  0xb1   : > { %3939 = shalt.err (!%p3936_p1)
}
  0xb2   : > { %3698 = dma.hbm_to_vmem [thread:$0]  (!%p4845_p6), %s4814_s6, 16, %s293_s19, [#allocation14]  }
  0xb3   : > { %s3940_s21 = scalar_lea.hbm %s4279_s20, 32768  ;;  %p4846_p2 = scmp.ne.s32.totalorder %s4844_s24, 0 }
  0xb4   : > { %p3941_p8 = scmp.ne.s32.totalorder %s4279_s20, %s3940_s21  ;;  %s3945_s0 = scalar_lea.hbm %s4810_s2, 65536 }
  0xb5   : > { %p4847_p12 = pneg %p4846_p2  ;;  %p3946_p4 = scmp.lt.u32.totalorder %s4279_s20, %s4810_s2 }
  0xb6   : > { %p3947_p10 = scmp.lt.u32.totalorder %s3945_s0, %s3940_s21  ;;  %p3949_p0 = scmp.lt.u32.totalorder %s3940_s21, %s4279_s20 }
  0xb7   : > { %p3943_p7 = pnand %p3941_p8, %p4847_p12 }
  0xb8   : > { %p3948_p11 = por %p3947_p10, %p3946_p4 }
  0xb9   : > { %p3944_p13 = pneg %p3943_p7 }
  0xba   : > { %p3950_p5 = por %p3949_p0, %p3948_p11 }
  0xbc   : > { %p3951_p9 = pnand %p3950_p5, %p3944_p13 }
  0xbe   : > { %3954 = shalt.err (!%p3951_p9)
}
  0xbf   : > { %s3955_s19 = scalar_lea.vmem %s4310_s26, 32768  ;;  %p4848_p3 = pmov %p4847_p12 }
  0xc0   : > { %p3956_p6 = scmp.ne.s32.totalorder %s4310_s26, %s3955_s19  ;;  %s4094_s8 = smov [#allocation8]  }
  0xc1   : > { %s3960_s25 = sshll.u32 %s4094_s8, 4  ;;  %s3961_s25 = int_to_ptr.vmem [resolvable:$false] %s3960_s25 }
  0xc2   : > { %p3958_p1 = pnand %p3956_p6, %p4848_p3  ;;  %s3962_s9 = scalar_lea.vmem %s3961_s25, 65536 }
  0xc3   : > { %p3963_p12 = scmp.lt.s32.totalorder %s4310_s26, %s3961_s25  ;;  %p3964_p7 = scmp.lt.s32.totalorder %s3962_s9, %s3955_s19 }
  0xc4   : > { %p3959_p8 = pneg %p3958_p1 }
  0xc5   : > { %p3965_p4 = por %p3964_p7, %p3963_p12 }
  0xc7   : > { %p3966_p10 = pnand %p3965_p4, %p3959_p8 }
  0xc9   : > { %3969 = shalt.err (!%p3966_p10)
}
  0xca   : > { %s4095_s27 = smov 16384   ;;  %s4096_s14 = smov 8192  }
  0xcb   : > { %s4097_s1 = smov 512   ;;  %p4849_p13 = scmp.ne.s32.totalorder %s4834_s12, 0 }
  0xcc   : > { %3705 = dma.hbm_to_vmem [thread:$0]  (!%p4846_p2), %s4279_s20, 32768, %s4310_s26, %s4281_s10, %s4095_s27, %s4096_s14, %s4097_s1  }
  0xcd   : > { %345 = sbr.rel (%p4849_p13) target bundleno = 1188 (0x4a4), region = 48  ;;  %s347_s4 = sand.u32 (!%p4849_p13), 1, %s4171_s11  }
  0xce   : > { %s349_s22 = sand.u32 (!%p4849_p13), 1, %s4076_s28   ;;  %s348_s13 = scalar_lea.sflag (!%p4849_p13), [#allocation4], %s347_s4 }
  0xcf   : > { %s3330_s30 = sshll.u32 (!%p4849_p13), %s349_s22, 9  ;;  %p4850_p11 = scmp.ne.s32.totalorder (!%p4849_p13), %s4842_s16, 0 }
  0xd0   : > { %s4394_s17 = scalar_lea.vmem (!%p4849_p13), [#allocation3], %s3330_s30 }
  0xd4   : > { %4039 = dma.done.wait (%p4850_p11), %s348_s13, 8192  }
  0xd5   : > { %4041 = vsyncadd (%p4850_p11), %s348_s13, 4294959104  ;;  %p4851_p0 = scmp.eq.s32.totalorder %s4171_s11, 0 }
  0xd7   : > { %4043 = dma.done.wait (%p4851_p0), [#allocation7], 128   ;;  %p4852_p2 = pmov %p4851_p0 }
  0xd8   : > { %s3332_s12 = sshll.u32 %s349_s22, 11 }
  0xd9   : > { %4045 = vsyncadd (%p4852_p2), [#allocation7], 4294967168  ;;  %s4404_s24 = scalar_lea.vmem [#allocation8], %s3332_s12 }
  0xda   : > { %4047 = dma.done.wait (%p4850_p11), %s348_s13, 32768  }
  0xdb   : > { %4049 = vsyncadd (%p4850_p11), %s348_s13, 4294934528  ;;  %p4853_p5 = pmov %p4851_p0 }
  0xdc   : > { %p4854_p9 = pmov %p4851_p0 }
  0xdd   : > { %4051 = dma.done.wait (%p4853_p5), [#allocation7], 512  }
  0xde   : > { %4053 = vsyncadd (%p4854_p9), [#allocation7], 4294966784  ;;  %p4855_p6 = pmov %p4851_p0 }
  0xdf   : > { %p4856_p3 = pmov %p4851_p0 }
  0xe0   : > { %4055 = dma.done.wait (%p4855_p6), [#allocation11], 528  }
  0xe1   : > { %4057 = vsyncadd (%p4856_p3), [#allocation11], 4294966768  ;;  %p4857_p1 = pmov %p4851_p0 }
  0xe2   : > { %p4858_p8 = pmov %p4851_p0 }
  0xe3   : > { %4059 = dma.done.wait (%p4857_p1), [#allocation14], 16  }
  0xe4   : > { %4061 = vsyncadd (%p4858_p8), [#allocation14], 4294967280  ;;  %p4859_p12 = scmp.ne.s32.totalorder %s4171_s11, 0 }
  0xe5   : > { %vm419_vm0 = vcmask (!%p4859_p12), 261120   ;;  %v4098_v0 = vmov (!%p4859_p12), 0.0  }
  0xe6   : > { %418 = sbr.rel (%p4859_p12) target bundleno = 237 (0xed), region = 80  ;;  %420 = vst.msk [vmem:[#allocation2] sm:$0xff] (!%p4859_p12), %vm419_vm0, %v4098_v0 }
  0xed PF: > { %v487_v1 = vld [vmem:[%s4404_s24 + $0x8] sm:$0xff]  ;;  %v486_v3 = vld [vmem:[%s4404_s24] sm:$0xff]  ;;  %v489_v6 = vld [vmem:[%s4404_s24 + $0x18] sm:$0xff]  ;;  %vm2983_vm1 = vcmask 261120   ;;  %p3338_p7 = scmp.ne.s32.totalorder %s4171_s11, 1 }
  0xee   : > { %v551_v2 = vld [vmem:[%s4404_s24 + $0x208] sm:$0xff]  ;;  %v550_v5 = vld [vmem:[%s4404_s24 + $0x200] sm:$0xff]  ;;  %v553_v7 = vld [vmem:[%s4404_s24 + $0x218] sm:$0xff]  ;;  %vm4100_vm2 = vmmov (!%p3338_p7), 0   ;;  %s4102_s16 = smov (!%p3338_p7), 96  }
  0xef   : > { %v3383_v4 = vpack.c.bf16 %v551_v2, %v487_v1  ;;  %v3385_v8 = vpack.c.bf16 %v550_v5, %v486_v3  ;;  %v3391_v9 = vpack.c.bf16 %v553_v7, %v489_v6  ;;  %v488_v10 = vld [vmem:[%s4404_s24 + $0x10] sm:$0xff]  ;;  %v615_v12 = vld [vmem:[%s4404_s24 + $0x408] sm:$0xff]  ;;  %v614_v15 = vld [vmem:[%s4404_s24 + $0x400] sm:$0xff] }
  0xf0   : > { %v552_v11 = vld [vmem:[%s4404_s24 + $0x210] sm:$0xff]  ;;  %v679_v14 = vld [vmem:[%s4404_s24 + $0x608] sm:$0xff]  ;;  %v678_v17 = vld [vmem:[%s4404_s24 + $0x600] sm:$0xff] }
  0xf1   : > { %3384 = vmatprep.subr.bf16.mxu0 %v3383_v4  ;;  %v3393_v13 = vpack.c.bf16 %v552_v11, %v488_v10  ;;  %3392 = vmatprep.subr.bf16.mxu1 %v3391_v9  ;;  %v3387_v16 = vpack.c.bf16 %v679_v14, %v615_v12  ;;  %v617_v18 = vld [vmem:[%s4404_s24 + $0x418] sm:$0xff]  ;;  %v616_v21 = vld [vmem:[%s4404_s24 + $0x410] sm:$0xff]  ;;  %v423_v23 = vld [vmem:[%s4394_s17 + $0x8] sm:$0xff]  ;;  %v3389_v27 = vpack.c.bf16 %v678_v17, %v614_v15 }
  0xf2   : > { %3386 = vmatpush1.bf16.xpose.msra.mxu0 %v3385_v8  ;;  %v681_v19 = vld [vmem:[%s4404_s24 + $0x618] sm:$0xff]  ;;  %v680_v22 = vld [vmem:[%s4404_s24 + $0x610] sm:$0xff]  ;;  %806 = vmatprep.mubr.f32.mxu0 %v423_v23  ;;  %v491_v25 = vld [vmem:[%s4404_s24 + $0x28] sm:$0xff] }
  0xf3   : > { %3394 = vmatpush1.bf16.xpose.msra.mxu1 %v3393_v13  ;;  %v3395_v20 = vpack.c.bf16 %v681_v19, %v617_v18  ;;  %3388 = vmatprep.subr.bf16.mxu0 %v3387_v16  ;;  %v425_v24 = vld [vmem:[%s4394_s17 + $0x18] sm:$0xff]  ;;  %v555_v26 = vld [vmem:[%s4404_s24 + $0x228] sm:$0xff]  ;;  %v493_v28 = vld [vmem:[%s4404_s24 + $0x38] sm:$0xff]  ;;  %v3397_v30 = vpack.c.bf16 %v680_v22, %v616_v21 }
  0xf4   : > { %876 = vmatprep.mubr.f32.mxu1 %v425_v24  ;;  %v557_v29 = vld [vmem:[%s4404_s24 + $0x238] sm:$0xff]  ;;  %v3399_v31 = vpack.c.bf16 %v555_v26, %v491_v25  ;;  %v490_v33 = vld [vmem:[%s4404_s24 + $0x20] sm:$0xff]  ;;  %v492_v35 = vld [vmem:[%s4404_s24 + $0x30] sm:$0xff] }
  0xf5   : > { %3396 = vmatprep.subr.bf16.mxu1 %v3395_v20  ;;  %v3407_v32 = vpack.c.bf16 %v557_v29, %v493_v28  ;;  %v554_v34 = vld [vmem:[%s4404_s24 + $0x220] sm:$0xff]  ;;  %v556_v36 = vld [vmem:[%s4404_s24 + $0x230] sm:$0xff]  ;;  %v619_v37 = vld [vmem:[%s4404_s24 + $0x428] sm:$0xff] }
  0xf6   : > { %v683_v38 = vld [vmem:[%s4404_s24 + $0x628] sm:$0xff]  ;;  %v621_v39 = vld [vmem:[%s4404_s24 + $0x438] sm:$0xff]  ;;  %v3401_v42 = vpack.c.bf16 %v554_v34, %v490_v33  ;;  %v3409_v44 = vpack.c.bf16 %v556_v36, %v492_v35  ;;  %v427_v47 = vld [vmem:[%s4394_s17 + $0x28] sm:$0xff] }
  0xf7   : > { %v685_v40 = vld [vmem:[%s4404_s24 + $0x638] sm:$0xff]  ;;  %v424_v43 = vld [vmem:[%s4394_s17 + $0x10] sm:$0xff]  ;;  %v3403_v45 = vpack.c.bf16 %v683_v38, %v619_v37  ;;  %v429_v48 = vld [vmem:[%s4394_s17 + $0x38] sm:$0xff] }
  0xf8   : > { %v422_v41 = vld [vmem:[%s4394_s17] sm:$0xff]  ;;  %v3411_v46 = vpack.c.bf16 %v685_v40, %v621_v39  ;;  %v618_v49 = vld [vmem:[%s4404_s24 + $0x420] sm:$0xff]  ;;  %v620_v51 = vld [vmem:[%s4404_s24 + $0x430] sm:$0xff] }
  0xf9   : > { %v682_v50 = vld [vmem:[%s4404_s24 + $0x620] sm:$0xff]  ;;  %v684_v52 = vld [vmem:[%s4404_s24 + $0x630] sm:$0xff]  ;;  %v495_v53 = vld [vmem:[%s4404_s24 + $0x48] sm:$0xff] }
  0xfa   : > { %3390 = vmatpush1.bf16.xpose.msra.mxu0 %v3389_v27  ;;  %v559_v54 = vld [vmem:[%s4404_s24 + $0x248] sm:$0xff]  ;;  %v497_v55 = vld [vmem:[%s4404_s24 + $0x58] sm:$0xff]  ;;  %v3405_v57 = vpack.c.bf16 %v682_v50, %v618_v49  ;;  %v3413_v58 = vpack.c.bf16 %v684_v52, %v620_v51  ;;  %v494_v61 = vld [vmem:[%s4404_s24 + $0x40] sm:$0xff] }
  0xfb   : > { %3398 = vmatpush1.bf16.xpose.msra.mxu1 %v3397_v30  ;;  %3400 = vmatprep.subr.bf16.mxu0 %v3399_v31  ;;  %v561_v56 = vld [vmem:[%s4404_s24 + $0x258] sm:$0xff]  ;;  %v3415_v59 = vpack.c.bf16 %v559_v54, %v495_v53  ;;  %v558_v62 = vld [vmem:[%s4404_s24 + $0x240] sm:$0xff]  ;;  %v496_v63 = vld [vmem:[%s4404_s24 + $0x50] sm:$0xff] }
  0xfc   : > { %3408 = vmatprep.subr.bf16.mxu1 %v3407_v32  ;;  %v3423_v60 = vpack.c.bf16 %v561_v56, %v497_v55  ;;  %v560_v0 = vld [vmem:[%s4404_s24 + $0x250] sm:$0xff]  ;;  %v623_v1 = vld [vmem:[%s4404_s24 + $0x448] sm:$0xff]  ;;  %v625_v3 = vld [vmem:[%s4404_s24 + $0x458] sm:$0xff]  ;;  %v3417_v6 = vpack.c.bf16 %v558_v62, %v494_v61 }
  0xfd   : > { %v687_v2 = vld [vmem:[%s4404_s24 + $0x648] sm:$0xff]  ;;  %v689_v4 = vld [vmem:[%s4404_s24 + $0x658] sm:$0xff]  ;;  %v3425_v8 = vpack.c.bf16 %v560_v0, %v496_v63  ;;  %v431_v11 = vld [vmem:[%s4394_s17 + $0x48] sm:$0xff] }
  0xfe   : > { %v426_v5 = vld [vmem:[%s4394_s17 + $0x20] sm:$0xff]  ;;  %v428_v7 = vld [vmem:[%s4394_s17 + $0x30] sm:$0xff]  ;;  %v3419_v9 = vpack.c.bf16 %v687_v2, %v623_v1  ;;  %v3427_v10 = vpack.c.bf16 %v689_v4, %v625_v3  ;;  %v433_v12 = vld [vmem:[%s4394_s17 + $0x58] sm:$0xff] }
  0xff   : > { %v622_v13 = vld [vmem:[%s4404_s24 + $0x440] sm:$0xff]  ;;  %v624_v15 = vld [vmem:[%s4404_s24 + $0x450] sm:$0xff]  ;;  %v499_v17 = vld [vmem:[%s4404_s24 + $0x68] sm:$0xff] }
 0x100   : > { %v686_v14 = vld [vmem:[%s4404_s24 + $0x640] sm:$0xff]  ;;  %v688_v16 = vld [vmem:[%s4404_s24 + $0x650] sm:$0xff]  ;;  %v563_v18 = vld [vmem:[%s4404_s24 + $0x268] sm:$0xff] }
 0x101   : > { %807 = vmatmul.mubr.f32.vlgmr.msra.gmra.mrb[0].mxu0 %v422_v41  ;;  %v501_v19 = vld [vmem:[%s4404_s24 + $0x78] sm:$0xff]  ;;  %v3421_v21 = vpack.c.bf16 %v686_v14, %v622_v13  ;;  %v3429_v22 = vpack.c.bf16 %v688_v16, %v624_v15  ;;  %v3431_v23 = vpack.c.bf16 %v563_v18, %v499_v17  ;;  %v498_v25 = vld [vmem:[%s4404_s24 + $0x60] sm:$0xff]  ;;  %v500_v27 = vld [vmem:[%s4404_s24 + $0x70] sm:$0xff] }
 0x102   : > { %877 = vmatmul.mubr.f32.vlgmr.msra.gmra.mrb[0].mxu1 %v424_v43  ;;  %3402 = vmatpush1.bf16.xpose.msra.mxu0 %v3401_v42  ;;  %v565_v20 = vld [vmem:[%s4404_s24 + $0x278] sm:$0xff]  ;;  %v562_v26 = vld [vmem:[%s4404_s24 + $0x260] sm:$0xff]  ;;  %v564_v28 = vld [vmem:[%s4404_s24 + $0x270] sm:$0xff] }
 0x103   : > { %3410 = vmatpush1.bf16.xpose.msra.mxu1 %v3409_v44  ;;  %3404 = vmatprep.subr.bf16.mxu0 %v3403_v45  ;;  %v3439_v24 = vpack.c.bf16 %v565_v20, %v501_v19  ;;  %v627_v29 = vld [vmem:[%s4404_s24 + $0x468] sm:$0xff]  ;;  %v629_v31 = vld [vmem:[%s4404_s24 + $0x478] sm:$0xff]  ;;  %v3433_v34 = vpack.c.bf16 %v562_v26, %v498_v25  ;;  %v3441_v36 = vpack.c.bf16 %v564_v28, %v500_v27  ;;  %v435_v39 = vld [vmem:[%s4394_s17 + $0x68] sm:$0xff] }
 0x104   : > { %3412 = vmatprep.subr.bf16.mxu1 %v3411_v46  ;;  %946 = vmatprep.mubr.f32.mxu0 %v427_v47  ;;  %v691_v30 = vld [vmem:[%s4404_s24 + $0x668] sm:$0xff]  ;;  %v693_v32 = vld [vmem:[%s4404_s24 + $0x678] sm:$0xff]  ;;  %v437_v40 = vld [vmem:[%s4394_s17 + $0x78] sm:$0xff] }
 0x105   : > { %1016 = vmatprep.mubr.f32.mxu1 %v429_v48  ;;  %v430_v33 = vld [vmem:[%s4394_s17 + $0x40] sm:$0xff]  ;;  %v432_v35 = vld [vmem:[%s4394_s17 + $0x50] sm:$0xff]  ;;  %v3435_v37 = vpack.c.bf16 %v691_v30, %v627_v29  ;;  %v3443_v38 = vpack.c.bf16 %v693_v32, %v629_v31  ;;  %v626_v41 = vld [vmem:[%s4404_s24 + $0x460] sm:$0xff] }
 0x106   : > { %v690_v42 = vld [vmem:[%s4404_s24 + $0x660] sm:$0xff]  ;;  %v628_v43 = vld [vmem:[%s4404_s24 + $0x470] sm:$0xff]  ;;  %v503_v45 = vld [vmem:[%s4404_s24 + $0x88] sm:$0xff] }
 0x107   : > { %v692_v44 = vld [vmem:[%s4404_s24 + $0x670] sm:$0xff]  ;;  %v567_v46 = vld [vmem:[%s4404_s24 + $0x288] sm:$0xff]  ;;  %v505_v47 = vld [vmem:[%s4404_s24 + $0x98] sm:$0xff]  ;;  %v3437_v49 = vpack.c.bf16 %v690_v42, %v626_v41 }
 0x108   : > { %v569_v48 = vld [vmem:[%s4404_s24 + $0x298] sm:$0xff]  ;;  %v3445_v50 = vpack.c.bf16 %v692_v44, %v628_v43  ;;  %v3447_v51 = vpack.c.bf16 %v567_v46, %v503_v45  ;;  %v502_v53 = vld [vmem:[%s4404_s24 + $0x80] sm:$0xff]  ;;  %v504_v55 = vld [vmem:[%s4404_s24 + $0x90] sm:$0xff] }
 0x109   : > { %v3455_v52 = vpack.c.bf16 %v569_v48, %v505_v47  ;;  %v566_v54 = vld [vmem:[%s4404_s24 + $0x280] sm:$0xff]  ;;  %v568_v56 = vld [vmem:[%s4404_s24 + $0x290] sm:$0xff]  ;;  %v434_v61 = vld [vmem:[%s4394_s17 + $0x60] sm:$0xff] }
 0x10a   : > { %3406 = vmatpush1.bf16.xpose.msra.mxu0 %v3405_v57  ;;  %v631_v57 = vld [vmem:[%s4404_s24 + $0x488] sm:$0xff]  ;;  %v3449_v62 = vpack.c.bf16 %v566_v54, %v502_v53  ;;  %v3457_v0 = vpack.c.bf16 %v568_v56, %v504_v55  ;;  %v439_v3 = vld [vmem:[%s4394_s17 + $0x88] sm:$0xff]  ;;  %v441_v4 = vld [vmem:[%s4394_s17 + $0x98] sm:$0xff] }
 0x10b   : > { %3414 = vmatpush1.bf16.xpose.msra.mxu1 %v3413_v58  ;;  %3416 = vmatprep.subr.bf16.mxu0 %v3415_v59  ;;  %v695_v58 = vld [vmem:[%s4404_s24 + $0x688] sm:$0xff]  ;;  %v633_v59 = vld [vmem:[%s4404_s24 + $0x498] sm:$0xff]  ;;  %v506_v17 = vld [vmem:[%s4404_s24 + $0xa0] sm:$0xff] }
 0x10c   : > { %3424 = vmatprep.subr.bf16.mxu1 %v3423_v60  ;;  %v697_v60 = vld [vmem:[%s4404_s24 + $0x698] sm:$0xff]  ;;  %v436_v63 = vld [vmem:[%s4394_s17 + $0x70] sm:$0xff]  ;;  %v3451_v1 = vpack.c.bf16 %v695_v58, %v631_v57  ;;  %v570_v18 = vld [vmem:[%s4404_s24 + $0x2a0] sm:$0xff] }
 0x10d   : > { %v3459_v2 = vpack.c.bf16 %v697_v60, %v633_v59  ;;  %v508_v19 = vld [vmem:[%s4404_s24 + $0xb0] sm:$0xff]  ;;  %v438_v25 = vld [vmem:[%s4394_s17 + $0x80] sm:$0xff]  ;;  %v3465_v26 = vpack.c.bf16 %v570_v18, %v506_v17  ;;  %v440_v27 = vld [vmem:[%s4394_s17 + $0x90] sm:$0xff] }
 0x10e   : > { %v572_v20 = vld [vmem:[%s4404_s24 + $0x2b0] sm:$0xff]  ;;  %v443_v31 = vld [vmem:[%s4394_s17 + $0xa8] sm:$0xff]  ;;  %v442_v53 = vld [vmem:[%s4394_s17 + $0xa0] sm:$0xff] }
 0x10f   : > { %v3473_v28 = vpack.c.bf16 %v572_v20, %v508_v19  ;;  %v445_v32 = vld [vmem:[%s4394_s17 + $0xb8] sm:$0xff]  ;;  %v510_v45 = vld [vmem:[%s4404_s24 + $0xc0] sm:$0xff]  ;;  %v444_v55 = vld [vmem:[%s4394_s17 + $0xb0] sm:$0xff] }
 0x110   : > { %v574_v46 = vld [vmem:[%s4404_s24 + $0x2c0] sm:$0xff]  ;;  %v512_v47 = vld [vmem:[%s4404_s24 + $0xd0] sm:$0xff]  ;;  %v446_v17 = vld [vmem:[%s4394_s17 + $0xc0] sm:$0xff] }
 0x111   : > { %947 = vmatmul.mubr.f32.vlgmr.msra.gmra.mrb[2].mxu0 %v426_v5  ;;  %v630_v5 = vld [vmem:[%s4404_s24 + $0x480] sm:$0xff]  ;;  %v576_v48 = vld [vmem:[%s4404_s24 + $0x2d0] sm:$0xff]  ;;  %v3481_v54 = vpack.c.bf16 %v574_v46, %v510_v45  ;;  %v448_v19 = vld [vmem:[%s4394_s17 + $0xd0] sm:$0xff] }
 0x112   : > { %3418 = vmatpush1.bf16.xpose.msra.mxu0 %v3417_v6  ;;  %1017 = vmatmul.mubr.f32.vlgmr.msra.gmra.mrb[2].mxu1 %v428_v7  ;;  %v694_v6 = vld [vmem:[%s4404_s24 + $0x680] sm:$0xff]  ;;  %v632_v7 = vld [vmem:[%s4404_s24 + $0x490] sm:$0xff]  ;;  %v3489_v56 = vpack.c.bf16 %v576_v48, %v512_v47  ;;  %v450_v45 = vld [vmem:[%s4394_s17 + $0xe0] sm:$0xff] }
 0x113   : > { %3426 = vmatpush1.bf16.xpose.msra.mxu1 %v3425_v8  ;;  %3420 = vmatprep.subr.bf16.mxu0 %v3419_v9  ;;  %v696_v8 = vld [vmem:[%s4404_s24 + $0x690] sm:$0xff]  ;;  %v507_v9 = vld [vmem:[%s4404_s24 + $0xa8] sm:$0xff]  ;;  %v3453_v13 = vpack.c.bf16 %v694_v6, %v630_v5  ;;  %v447_v59 = vld [vmem:[%s4394_s17 + $0xc8] sm:$0xff] }
 0x114   : > { %3428 = vmatprep.subr.bf16.mxu1 %v3427_v10  ;;  %1086 = vmatprep.mubr.f32.mxu0 %v431_v11  ;;  %v571_v10 = vld [vmem:[%s4404_s24 + $0x2a8] sm:$0xff]  ;;  %v509_v11 = vld [vmem:[%s4404_s24 + $0xb8] sm:$0xff]  ;;  %v3461_v14 = vpack.c.bf16 %v696_v8, %v632_v7  ;;  %v449_v60 = vld [vmem:[%s4394_s17 + $0xd8] sm:$0xff] }
 0x115   : > { %1156 = vmatprep.mubr.f32.mxu1 %v433_v12  ;;  %v573_v12 = vld [vmem:[%s4404_s24 + $0x2b8] sm:$0xff]  ;;  %v3463_v15 = vpack.c.bf16 %v571_v10, %v507_v9  ;;  %v514_v9 = vld [vmem:[%s4404_s24 + $0xe0] sm:$0xff]  ;;  %v452_v47 = vld [vmem:[%s4394_s17 + $0xf0] sm:$0xff] }
 0x116   : > { %v3471_v16 = vpack.c.bf16 %v573_v12, %v509_v11  ;;  %v578_v10 = vld [vmem:[%s4404_s24 + $0x2e0] sm:$0xff]  ;;  %v516_v11 = vld [vmem:[%s4404_s24 + $0xf0] sm:$0xff] }
 0x117   : > { %v580_v12 = vld [vmem:[%s4404_s24 + $0x2f0] sm:$0xff]  ;;  %v3497_v18 = vpack.c.bf16 %v578_v10, %v514_v9  ;;  %v454_v9 = vld [vmem:[%s4394_s17 + $0x100] sm:$0xff] }
 0x118   : > { %v3505_v20 = vpack.c.bf16 %v580_v12, %v516_v11  ;;  %v456_v11 = vld [vmem:[%s4394_s17 + $0x110] sm:$0xff] }
 0x11a   : > { %3422 = vmatpush1.bf16.xpose.msra.mxu0 %v3421_v21  ;;  %v635_v21 = vld [vmem:[%s4404_s24 + $0x4a8] sm:$0xff] }
 0x11b   : > { %3430 = vmatpush1.bf16.xpose.msra.mxu1 %v3429_v22  ;;  %3432 = vmatprep.subr.bf16.mxu0 %v3431_v23  ;;  %v699_v22 = vld [vmem:[%s4404_s24 + $0x6a8] sm:$0xff]  ;;  %v637_v23 = vld [vmem:[%s4404_s24 + $0x4b8] sm:$0xff] }
 0x11c   : > { %3440 = vmatprep.subr.bf16.mxu1 %v3439_v24  ;;  %v701_v24 = vld [vmem:[%s4404_s24 + $0x6b8] sm:$0xff]  ;;  %v3467_v29 = vpack.c.bf16 %v699_v22, %v635_v21 }
 0x11d   : > { %v3475_v30 = vpack.c.bf16 %v701_v24, %v637_v23  ;;  %v451_v23 = vld [vmem:[%s4394_s17 + $0xe8] sm:$0xff]  ;;  %v453_v24 = vld [vmem:[%s4394_s17 + $0xf8] sm:$0xff] }
 0x121   : > { %1087 = vmatmul.mubr.f32.vlgmr.msra.gmra.mrb[4].mxu0 %v430_v33  ;;  %v634_v33 = vld [vmem:[%s4404_s24 + $0x4a0] sm:$0xff] }
 0x122   : > { %3434 = vmatpush1.bf16.xpose.msra.mxu0 %v3433_v34  ;;  %1157 = vmatmul.mubr.f32.vlgmr.msra.gmra.mrb[4].mxu1 %v432_v35  ;;  %v698_v34 = vld [vmem:[%s4404_s24 + $0x6a0] sm:$0xff]  ;;  %v636_v35 = vld [vmem:[%s4404_s24 + $0x4b0] sm:$0xff] }
 0x123   : > { %3442 = vmatpush1.bf16.xpose.msra.mxu1 %v3441_v36  ;;  %3436 = vmatprep.subr.bf16.mxu0 %v3435_v37  ;;  %v700_v36 = vld [vmem:[%s4404_s24 + $0x6b0] sm:$0xff]  ;;  %v511_v37 = vld [vmem:[%s4404_s24 + $0xc8] sm:$0xff]  ;;  %v3469_v41 = vpack.c.bf16 %v698_v34, %v634_v33 }
 0x124   : > { %3444 = vmatprep.subr.bf16.mxu1 %v3443_v38  ;;  %1226 = vmatprep.mubr.f32.mxu0 %v435_v39  ;;  %v575_v38 = vld [vmem:[%s4404_s24 + $0x2c8] sm:$0xff]  ;;  %v513_v39 = vld [vmem:[%s4404_s24 + $0xd8] sm:$0xff]  ;;  %v3477_v42 = vpack.c.bf16 %v700_v36, %v636_v35 }
 0x125   : > { %1296 = vmatprep.mubr.f32.mxu1 %v437_v40  ;;  %v577_v40 = vld [vmem:[%s4404_s24 + $0x2d8] sm:$0xff]  ;;  %v3479_v43 = vpack.c.bf16 %v575_v38, %v511_v37  ;;  %v518_v37 = vld [vmem:[%s4404_s24 + $0x100] sm:$0xff] }
 0x126   : > { %v3487_v44 = vpack.c.bf16 %v577_v40, %v513_v39  ;;  %v582_v38 = vld [vmem:[%s4404_s24 + $0x300] sm:$0xff]  ;;  %v520_v39 = vld [vmem:[%s4404_s24 + $0x110] sm:$0xff] }
 0x127   : > { %v584_v40 = vld [vmem:[%s4404_s24 + $0x310] sm:$0xff]  ;;  %v3513_v46 = vpack.c.bf16 %v582_v38, %v518_v37  ;;  %v458_v37 = vld [vmem:[%s4394_s17 + $0x120] sm:$0xff] }
 0x128   : > { %v3521_v48 = vpack.c.bf16 %v584_v40, %v520_v39  ;;  %v460_v39 = vld [vmem:[%s4394_s17 + $0x130] sm:$0xff] }
 0x12a   : > { %3438 = vmatpush1.bf16.xpose.msra.mxu0 %v3437_v49  ;;  %v639_v49 = vld [vmem:[%s4404_s24 + $0x4c8] sm:$0xff] }
 0x12b   : > { %3446 = vmatpush1.bf16.xpose.msra.mxu1 %v3445_v50  ;;  %3448 = vmatprep.subr.bf16.mxu0 %v3447_v51  ;;  %v703_v50 = vld [vmem:[%s4404_s24 + $0x6c8] sm:$0xff]  ;;  %v641_v51 = vld [vmem:[%s4404_s24 + $0x4d8] sm:$0xff] }
 0x12c   : > { %3456 = vmatprep.subr.bf16.mxu1 %v3455_v52  ;;  %v705_v52 = vld [vmem:[%s4404_s24 + $0x6d8] sm:$0xff]  ;;  %v3483_v57 = vpack.c.bf16 %v703_v50, %v639_v49 }
 0x12d   : > { %v3491_v58 = vpack.c.bf16 %v705_v52, %v641_v51  ;;  %v455_v51 = vld [vmem:[%s4394_s17 + $0x108] sm:$0xff]  ;;  %v457_v52 = vld [vmem:[%s4394_s17 + $0x118] sm:$0xff] }
 0x131   : > { %1227 = vmatmul.mubr.f32.vlgmr.msra.gmra.mrb[6].mxu0 %v434_v61  ;;  %v638_v61 = vld [vmem:[%s4404_s24 + $0x4c0] sm:$0xff] }
 0x132   : > { %3450 = vmatpush1.bf16.xpose.msra.mxu0 %v3449_v62  ;;  %1297 = vmatmul.mubr.f32.vlgmr.msra.gmra.mrb[6].mxu1 %v436_v63  ;;  %v702_v62 = vld [vmem:[%s4404_s24 + $0x6c0] sm:$0xff]  ;;  %v640_v63 = vld [vmem:[%s4404_s24 + $0x4d0] sm:$0xff] }
 0x133   : > { %3458 = vmatpush1.bf16.xpose.msra.mxu1 %v3457_v0  ;;  %3452 = vmatprep.subr.bf16.mxu0 %v3451_v1  ;;  %v704_v0 = vld [vmem:[%s4404_s24 + $0x6d0] sm:$0xff]  ;;  %v515_v1 = vld [vmem:[%s4404_s24 + $0xe8] sm:$0xff]  ;;  %v3485_v5 = vpack.c.bf16 %v702_v62, %v638_v61 }
 0x134   : > { %3460 = vmatprep.subr.bf16.mxu1 %v3459_v2  ;;  %1366 = vmatprep.mubr.f32.mxu0 %v439_v3  ;;  %v579_v2 = vld [vmem:[%s4404_s24 + $0x2e8] sm:$0xff]  ;;  %v517_v3 = vld [vmem:[%s4404_s24 + $0xf8] sm:$0xff]  ;;  %v3493_v6 = vpack.c.bf16 %v704_v0, %v640_v63 }
 0x135   : > { %1436 = vmatprep.mubr.f32.mxu1 %v441_v4  ;;  %v581_v4 = vld [vmem:[%s4404_s24 + $0x2f8] sm:$0xff]  ;;  %v3495_v7 = vpack.c.bf16 %v579_v2, %v515_v1  ;;  %v522_v1 = vld [vmem:[%s4404_s24 + $0x120] sm:$0xff] }
 0x136   : > { %v3503_v8 = vpack.c.bf16 %v581_v4, %v517_v3  ;;  %v586_v2 = vld [vmem:[%s4404_s24 + $0x320] sm:$0xff]  ;;  %v524_v3 = vld [vmem:[%s4404_s24 + $0x130] sm:$0xff] }
 0x137   : > { %v588_v4 = vld [vmem:[%s4404_s24 + $0x330] sm:$0xff]  ;;  %v3529_v10 = vpack.c.bf16 %v586_v2, %v522_v1  ;;  %v462_v1 = vld [vmem:[%s4394_s17 + $0x140] sm:$0xff] }
 0x138   : > { %v3537_v12 = vpack.c.bf16 %v588_v4, %v524_v3  ;;  %v464_v3 = vld [vmem:[%s4394_s17 + $0x150] sm:$0xff] }
 0x13a   : > { %3454 = vmatpush1.bf16.xpose.msra.mxu0 %v3453_v13  ;;  %v643_v13 = vld [vmem:[%s4404_s24 + $0x4e8] sm:$0xff] }
 0x13b   : > { %3462 = vmatpush1.bf16.xpose.msra.mxu1 %v3461_v14  ;;  %3464 = vmatprep.subr.bf16.mxu0 %v3463_v15  ;;  %v707_v14 = vld [vmem:[%s4404_s24 + $0x6e8] sm:$0xff]  ;;  %v645_v15 = vld [vmem:[%s4404_s24 + $0x4f8] sm:$0xff] }
 0x13c   : > { %3472 = vmatprep.subr.bf16.mxu1 %v3471_v16  ;;  %v709_v16 = vld [vmem:[%s4404_s24 + $0x6f8] sm:$0xff]  ;;  %v3499_v21 = vpack.c.bf16 %v707_v14, %v643_v13 }
 0x13d   : > { %v3507_v22 = vpack.c.bf16 %v709_v16, %v645_v15  ;;  %v459_v15 = vld [vmem:[%s4394_s17 + $0x128] sm:$0xff]  ;;  %v461_v16 = vld [vmem:[%s4394_s17 + $0x138] sm:$0xff] }
 0x141   : > { %1367 = vmatmul.mubr.f32.vlgmr.msra.gmra.mrb[8].mxu0 %v438_v25  ;;  %v642_v25 = vld [vmem:[%s4404_s24 + $0x4e0] sm:$0xff] }
 0x142   : > { %3466 = vmatpush1.bf16.xpose.msra.mxu0 %v3465_v26  ;;  %1437 = vmatmul.mubr.f32.vlgmr.msra.gmra.mrb[8].mxu1 %v440_v27  ;;  %v706_v26 = vld [vmem:[%s4404_s24 + $0x6e0] sm:$0xff]  ;;  %v644_v27 = vld [vmem:[%s4404_s24 + $0x4f0] sm:$0xff] }
 0x143   : > { %3474 = vmatpush1.bf16.xpose.msra.mxu1 %v3473_v28  ;;  %3468 = vmatprep.subr.bf16.mxu0 %v3467_v29  ;;  %v708_v28 = vld [vmem:[%s4404_s24 + $0x6f0] sm:$0xff]  ;;  %v519_v29 = vld [vmem:[%s4404_s24 + $0x108] sm:$0xff]  ;;  %v3501_v33 = vpack.c.bf16 %v706_v26, %v642_v25 }
 0x144   : > { %3476 = vmatprep.subr.bf16.mxu1 %v3475_v30  ;;  %1506 = vmatprep.mubr.f32.mxu0 %v443_v31  ;;  %v583_v30 = vld [vmem:[%s4404_s24 + $0x308] sm:$0xff]  ;;  %v521_v31 = vld [vmem:[%s4404_s24 + $0x118] sm:$0xff]  ;;  %v3509_v34 = vpack.c.bf16 %v708_v28, %v644_v27 }
 0x145   : > { %1576 = vmatprep.mubr.f32.mxu1 %v445_v32  ;;  %v585_v32 = vld [vmem:[%s4404_s24 + $0x318] sm:$0xff]  ;;  %v3511_v35 = vpack.c.bf16 %v583_v30, %v519_v29  ;;  %v526_v29 = vld [vmem:[%s4404_s24 + $0x140] sm:$0xff] }
 0x146   : > { %v3519_v36 = vpack.c.bf16 %v585_v32, %v521_v31  ;;  %v590_v30 = vld [vmem:[%s4404_s24 + $0x340] sm:$0xff]  ;;  %v528_v31 = vld [vmem:[%s4404_s24 + $0x150] sm:$0xff] }
 0x147   : > { %v592_v32 = vld [vmem:[%s4404_s24 + $0x350] sm:$0xff]  ;;  %v3545_v38 = vpack.c.bf16 %v590_v30, %v526_v29  ;;  %v466_v29 = vld [vmem:[%s4394_s17 + $0x160] sm:$0xff] }
 0x148   : > { %v3553_v40 = vpack.c.bf16 %v592_v32, %v528_v31  ;;  %v468_v31 = vld [vmem:[%s4394_s17 + $0x170] sm:$0xff] }
 0x14a   : > { %3470 = vmatpush1.bf16.xpose.msra.mxu0 %v3469_v41  ;;  %v647_v41 = vld [vmem:[%s4404_s24 + $0x508] sm:$0xff] }
 0x14b   : > { %3478 = vmatpush1.bf16.xpose.msra.mxu1 %v3477_v42  ;;  %3480 = vmatprep.subr.bf16.mxu0 %v3479_v43  ;;  %v711_v42 = vld [vmem:[%s4404_s24 + $0x708] sm:$0xff]  ;;  %v649_v43 = vld [vmem:[%s4404_s24 + $0x518] sm:$0xff] }
 0x14c   : > { %3488 = vmatprep.subr.bf16.mxu1 %v3487_v44  ;;  %v713_v44 = vld [vmem:[%s4404_s24 + $0x718] sm:$0xff]  ;;  %v3515_v49 = vpack.c.bf16 %v711_v42, %v647_v41 }
 0x14d   : > { %v3523_v50 = vpack.c.bf16 %v713_v44, %v649_v43  ;;  %v463_v43 = vld [vmem:[%s4394_s17 + $0x148] sm:$0xff]  ;;  %v465_v44 = vld [vmem:[%s4394_s17 + $0x158] sm:$0xff] }
 0x151   : > { %1507 = vmatmul.mubr.f32.vlgmr.msra.gmra.mrb[10].mxu0 %v442_v53  ;;  %v646_v53 = vld [vmem:[%s4404_s24 + $0x500] sm:$0xff] }
 0x152   : > { %3482 = vmatpush1.bf16.xpose.msra.mxu0 %v3481_v54  ;;  %1577 = vmatmul.mubr.f32.vlgmr.msra.gmra.mrb[10].mxu1 %v444_v55  ;;  %v710_v54 = vld [vmem:[%s4404_s24 + $0x700] sm:$0xff]  ;;  %v648_v55 = vld [vmem:[%s4404_s24 + $0x510] sm:$0xff] }
 0x153   : > { %3490 = vmatpush1.bf16.xpose.msra.mxu1 %v3489_v56  ;;  %3484 = vmatprep.subr.bf16.mxu0 %v3483_v57  ;;  %v712_v56 = vld [vmem:[%s4404_s24 + $0x710] sm:$0xff]  ;;  %v523_v57 = vld [vmem:[%s4404_s24 + $0x128] sm:$0xff]  ;;  %v3517_v61 = vpack.c.bf16 %v710_v54, %v646_v53 }
 0x154   : > { %3492 = vmatprep.subr.bf16.mxu1 %v3491_v58  ;;  %1646 = vmatprep.mubr.f32.mxu0 %v447_v59  ;;  %v587_v58 = vld [vmem:[%s4404_s24 + $0x328] sm:$0xff]  ;;  %v525_v59 = vld [vmem:[%s4404_s24 + $0x138] sm:$0xff]  ;;  %v3525_v62 = vpack.c.bf16 %v712_v56, %v648_v55 }
 0x155   : > { %1716 = vmatprep.mubr.f32.mxu1 %v449_v60  ;;  %v589_v60 = vld [vmem:[%s4404_s24 + $0x338] sm:$0xff]  ;;  %v3527_v63 = vpack.c.bf16 %v587_v58, %v523_v57  ;;  %v530_v57 = vld [vmem:[%s4404_s24 + $0x160] sm:$0xff] }
 0x156   : > { %v3535_v0 = vpack.c.bf16 %v589_v60, %v525_v59  ;;  %v594_v58 = vld [vmem:[%s4404_s24 + $0x360] sm:$0xff]  ;;  %v532_v59 = vld [vmem:[%s4404_s24 + $0x170] sm:$0xff] }
 0x157   : > { %v596_v60 = vld [vmem:[%s4404_s24 + $0x370] sm:$0xff]  ;;  %v3561_v2 = vpack.c.bf16 %v594_v58, %v530_v57  ;;  %v470_v57 = vld [vmem:[%s4394_s17 + $0x180] sm:$0xff] }
 0x158   : > { %v3569_v4 = vpack.c.bf16 %v596_v60, %v532_v59  ;;  %v472_v59 = vld [vmem:[%s4394_s17 + $0x190] sm:$0xff] }
 0x15a   : > { %3486 = vmatpush1.bf16.xpose.msra.mxu0 %v3485_v5  ;;  %v651_v5 = vld [vmem:[%s4404_s24 + $0x528] sm:$0xff] }
 0x15b   : > { %3494 = vmatpush1.bf16.xpose.msra.mxu1 %v3493_v6  ;;  %3496 = vmatprep.subr.bf16.mxu0 %v3495_v7  ;;  %v715_v6 = vld [vmem:[%s4404_s24 + $0x728] sm:$0xff]  ;;  %v653_v7 = vld [vmem:[%s4404_s24 + $0x538] sm:$0xff] }
 0x15c   : > { %3504 = vmatprep.subr.bf16.mxu1 %v3503_v8  ;;  %v717_v8 = vld [vmem:[%s4404_s24 + $0x738] sm:$0xff]  ;;  %v3531_v13 = vpack.c.bf16 %v715_v6, %v651_v5 }
 0x15d   : > { %v3539_v14 = vpack.c.bf16 %v717_v8, %v653_v7  ;;  %v467_v7 = vld [vmem:[%s4394_s17 + $0x168] sm:$0xff]  ;;  %v469_v8 = vld [vmem:[%s4394_s17 + $0x178] sm:$0xff] }
 0x161   : > { %1647 = vmatmul.mubr.f32.vlgmr.msra.gmra.mrb[12].mxu0 %v446_v17  ;;  %v650_v17 = vld [vmem:[%s4404_s24 + $0x520] sm:$0xff] }
 0x162   : > { %3498 = vmatpush1.bf16.xpose.msra.mxu0 %v3497_v18  ;;  %1717 = vmatmul.mubr.f32.vlgmr.msra.gmra.mrb[12].mxu1 %v448_v19  ;;  %v714_v18 = vld [vmem:[%s4404_s24 + $0x720] sm:$0xff]  ;;  %v652_v19 = vld [vmem:[%s4404_s24 + $0x530] sm:$0xff] }
 0x163   : > { %3506 = vmatpush1.bf16.xpose.msra.mxu1 %v3505_v20  ;;  %3500 = vmatprep.subr.bf16.mxu0 %v3499_v21  ;;  %v716_v20 = vld [vmem:[%s4404_s24 + $0x730] sm:$0xff]  ;;  %v527_v21 = vld [vmem:[%s4404_s24 + $0x148] sm:$0xff]  ;;  %v3533_v25 = vpack.c.bf16 %v714_v18, %v650_v17 }
 0x164   : > { %3508 = vmatprep.subr.bf16.mxu1 %v3507_v22  ;;  %1786 = vmatprep.mubr.f32.mxu0 %v451_v23  ;;  %v591_v22 = vld [vmem:[%s4404_s24 + $0x348] sm:$0xff]  ;;  %v529_v23 = vld [vmem:[%s4404_s24 + $0x158] sm:$0xff]  ;;  %v3541_v26 = vpack.c.bf16 %v716_v20, %v652_v19 }
 0x165   : > { %1856 = vmatprep.mubr.f32.mxu1 %v453_v24  ;;  %v593_v24 = vld [vmem:[%s4404_s24 + $0x358] sm:$0xff]  ;;  %v3543_v27 = vpack.c.bf16 %v591_v22, %v527_v21  ;;  %v534_v21 = vld [vmem:[%s4404_s24 + $0x180] sm:$0xff] }
 0x166   : > { %v3551_v28 = vpack.c.bf16 %v593_v24, %v529_v23  ;;  %v598_v22 = vld [vmem:[%s4404_s24 + $0x380] sm:$0xff]  ;;  %v536_v23 = vld [vmem:[%s4404_s24 + $0x190] sm:$0xff] }
 0x167   : > { %v600_v24 = vld [vmem:[%s4404_s24 + $0x390] sm:$0xff]  ;;  %v3577_v30 = vpack.c.bf16 %v598_v22, %v534_v21  ;;  %v474_v21 = vld [vmem:[%s4394_s17 + $0x1a0] sm:$0xff] }
 0x168   : > { %v3585_v32 = vpack.c.bf16 %v600_v24, %v536_v23  ;;  %v476_v23 = vld [vmem:[%s4394_s17 + $0x1b0] sm:$0xff] }
 0x16a   : > { %3502 = vmatpush1.bf16.xpose.msra.mxu0 %v3501_v33  ;;  %v655_v33 = vld [vmem:[%s4404_s24 + $0x548] sm:$0xff] }
 0x16b   : > { %3510 = vmatpush1.bf16.xpose.msra.mxu1 %v3509_v34  ;;  %3512 = vmatprep.subr.bf16.mxu0 %v3511_v35  ;;  %v719_v34 = vld [vmem:[%s4404_s24 + $0x748] sm:$0xff]  ;;  %v657_v35 = vld [vmem:[%s4404_s24 + $0x558] sm:$0xff] }
 0x16c   : > { %3520 = vmatprep.subr.bf16.mxu1 %v3519_v36  ;;  %v721_v36 = vld [vmem:[%s4404_s24 + $0x758] sm:$0xff]  ;;  %v3547_v41 = vpack.c.bf16 %v719_v34, %v655_v33 }
 0x16d   : > { %v3555_v42 = vpack.c.bf16 %v721_v36, %v657_v35  ;;  %v471_v35 = vld [vmem:[%s4394_s17 + $0x188] sm:$0xff]  ;;  %v473_v36 = vld [vmem:[%s4394_s17 + $0x198] sm:$0xff] }
 0x171   : > { %1787 = vmatmul.mubr.f32.vlgmr.msra.gmra.mrb[14].mxu0 %v450_v45  ;;  %v654_v45 = vld [vmem:[%s4404_s24 + $0x540] sm:$0xff] }
 0x172   : > { %3514 = vmatpush1.bf16.xpose.msra.mxu0 %v3513_v46  ;;  %1857 = vmatmul.mubr.f32.vlgmr.msra.gmra.mrb[14].mxu1 %v452_v47  ;;  %v718_v46 = vld [vmem:[%s4404_s24 + $0x740] sm:$0xff]  ;;  %v656_v47 = vld [vmem:[%s4404_s24 + $0x550] sm:$0xff] }
 0x173   : > { %3522 = vmatpush1.bf16.xpose.msra.mxu1 %v3521_v48  ;;  %3516 = vmatprep.subr.bf16.mxu0 %v3515_v49  ;;  %v720_v48 = vld [vmem:[%s4404_s24 + $0x750] sm:$0xff]  ;;  %v531_v49 = vld [vmem:[%s4404_s24 + $0x168] sm:$0xff]  ;;  %v3549_v53 = vpack.c.bf16 %v718_v46, %v654_v45 }
 0x174   : > { %3524 = vmatprep.subr.bf16.mxu1 %v3523_v50  ;;  %1926 = vmatprep.mubr.f32.mxu0 %v455_v51  ;;  %v595_v50 = vld [vmem:[%s4404_s24 + $0x368] sm:$0xff]  ;;  %v533_v51 = vld [vmem:[%s4404_s24 + $0x178] sm:$0xff]  ;;  %v3557_v54 = vpack.c.bf16 %v720_v48, %v656_v47 }
 0x175   : > { %1996 = vmatprep.mubr.f32.mxu1 %v457_v52  ;;  %v597_v52 = vld [vmem:[%s4404_s24 + $0x378] sm:$0xff]  ;;  %v3559_v55 = vpack.c.bf16 %v595_v50, %v531_v49  ;;  %v538_v49 = vld [vmem:[%s4404_s24 + $0x1a0] sm:$0xff] }
 0x176   : > { %v3567_v56 = vpack.c.bf16 %v597_v52, %v533_v51  ;;  %v602_v50 = vld [vmem:[%s4404_s24 + $0x3a0] sm:$0xff]  ;;  %v540_v51 = vld [vmem:[%s4404_s24 + $0x1b0] sm:$0xff] }
 0x177   : > { %v604_v52 = vld [vmem:[%s4404_s24 + $0x3b0] sm:$0xff]  ;;  %v3593_v58 = vpack.c.bf16 %v602_v50, %v538_v49  ;;  %v675_v50 = vld [vmem:[%s4404_s24 + $0x5e8] sm:$0xff] }
 0x178   : > { %v3601_v60 = vpack.c.bf16 %v604_v52, %v540_v51  ;;  %v612_v49 = vld [vmem:[%s4404_s24 + $0x3f0] sm:$0xff]  ;;  %v739_v51 = vld [vmem:[%s4404_s24 + $0x7e8] sm:$0xff]  ;;  %v677_v52 = vld [vmem:[%s4404_s24 + $0x5f8] sm:$0xff] }
 0x17a   : > { %3518 = vmatpush1.bf16.xpose.msra.mxu0 %v3517_v61  ;;  %v659_v61 = vld [vmem:[%s4404_s24 + $0x568] sm:$0xff] }
 0x17b   : > { %3526 = vmatpush1.bf16.xpose.msra.mxu1 %v3525_v62  ;;  %3528 = vmatprep.subr.bf16.mxu0 %v3527_v63  ;;  %v723_v62 = vld [vmem:[%s4404_s24 + $0x768] sm:$0xff]  ;;  %v661_v63 = vld [vmem:[%s4404_s24 + $0x578] sm:$0xff] }
 0x17c   : > { %3536 = vmatprep.subr.bf16.mxu1 %v3535_v0  ;;  %v725_v0 = vld [vmem:[%s4404_s24 + $0x778] sm:$0xff]  ;;  %v3563_v5 = vpack.c.bf16 %v723_v62, %v659_v61 }
 0x17d   : > { %v3571_v6 = vpack.c.bf16 %v725_v0, %v661_v63  ;;  %v475_v63 = vld [vmem:[%s4394_s17 + $0x1a8] sm:$0xff]  ;;  %v477_v0 = vld [vmem:[%s4394_s17 + $0x1b8] sm:$0xff] }
 0x181   : > { %1927 = vmatmul.mubr.f32.vlgmr.msra.gmra.mrb[16].mxu0 %v454_v9  ;;  %v658_v9 = vld [vmem:[%s4404_s24 + $0x560] sm:$0xff] }
 0x182   : > { %3530 = vmatpush1.bf16.xpose.msra.mxu0 %v3529_v10  ;;  %1997 = vmatmul.mubr.f32.vlgmr.msra.gmra.mrb[16].mxu1 %v456_v11  ;;  %v722_v10 = vld [vmem:[%s4404_s24 + $0x760] sm:$0xff]  ;;  %v660_v11 = vld [vmem:[%s4404_s24 + $0x570] sm:$0xff] }
 0x183   : > { %3538 = vmatpush1.bf16.xpose.msra.mxu1 %v3537_v12  ;;  %3532 = vmatprep.subr.bf16.mxu0 %v3531_v13  ;;  %v724_v12 = vld [vmem:[%s4404_s24 + $0x770] sm:$0xff]  ;;  %v535_v13 = vld [vmem:[%s4404_s24 + $0x188] sm:$0xff]  ;;  %v3565_v17 = vpack.c.bf16 %v722_v10, %v658_v9 }
 0x184   : > { %3540 = vmatprep.subr.bf16.mxu1 %v3539_v14  ;;  %2066 = vmatprep.mubr.f32.mxu0 %v459_v15  ;;  %v599_v14 = vld [vmem:[%s4404_s24 + $0x388] sm:$0xff]  ;;  %v537_v15 = vld [vmem:[%s4404_s24 + $0x198] sm:$0xff]  ;;  %v3573_v18 = vpack.c.bf16 %v724_v12, %v660_v11 }
 0x185   : > { %2136 = vmatprep.mubr.f32.mxu1 %v461_v16  ;;  %v601_v16 = vld [vmem:[%s4404_s24 + $0x398] sm:$0xff]  ;;  %v3575_v19 = vpack.c.bf16 %v599_v14, %v535_v13  ;;  %v542_v13 = vld [vmem:[%s4404_s24 + $0x1c0] sm:$0xff] }
 0x186   : > { %v3583_v20 = vpack.c.bf16 %v601_v16, %v537_v15  ;;  %v606_v14 = vld [vmem:[%s4404_s24 + $0x3c0] sm:$0xff]  ;;  %v544_v15 = vld [vmem:[%s4404_s24 + $0x1d0] sm:$0xff] }
 0x187   : > { %v608_v16 = vld [vmem:[%s4404_s24 + $0x3d0] sm:$0xff]  ;;  %v3609_v22 = vpack.c.bf16 %v606_v14, %v542_v13 }
 0x188   : > { %v3617_v24 = vpack.c.bf16 %v608_v16, %v544_v15 }
 0x18a   : > { %3534 = vmatpush1.bf16.xpose.msra.mxu0 %v3533_v25  ;;  %v663_v25 = vld [vmem:[%s4404_s24 + $0x588] sm:$0xff] }
 0x18b   : > { %3542 = vmatpush1.bf16.xpose.msra.mxu1 %v3541_v26  ;;  %3544 = vmatprep.subr.bf16.mxu0 %v3543_v27  ;;  %v727_v26 = vld [vmem:[%s4404_s24 + $0x788] sm:$0xff]  ;;  %v665_v27 = vld [vmem:[%s4404_s24 + $0x598] sm:$0xff] }
 0x18c   : > { %3552 = vmatprep.subr.bf16.mxu1 %v3551_v28  ;;  %v729_v28 = vld [vmem:[%s4404_s24 + $0x798] sm:$0xff]  ;;  %v3579_v33 = vpack.c.bf16 %v727_v26, %v663_v25 }
 0x18d   : > { %v3587_v34 = vpack.c.bf16 %v729_v28, %v665_v27  ;;  %v479_v27 = vld [vmem:[%s4394_s17 + $0x1c8] sm:$0xff]  ;;  %v481_v28 = vld [vmem:[%s4394_s17 + $0x1d8] sm:$0xff] }
 0x191   : > { %2067 = vmatmul.mubr.f32.vlgmr.msra.gmra.mrb[18].mxu0 %v458_v37  ;;  %v662_v37 = vld [vmem:[%s4404_s24 + $0x580] sm:$0xff] }
 0x192   : > { %3546 = vmatpush1.bf16.xpose.msra.mxu0 %v3545_v38  ;;  %2137 = vmatmul.mubr.f32.vlgmr.msra.gmra.mrb[18].mxu1 %v460_v39  ;;  %v726_v38 = vld [vmem:[%s4404_s24 + $0x780] sm:$0xff]  ;;  %v664_v39 = vld [vmem:[%s4404_s24 + $0x590] sm:$0xff] }
 0x193   : > { %3554 = vmatpush1.bf16.xpose.msra.mxu1 %v3553_v40  ;;  %3548 = vmatprep.subr.bf16.mxu0 %v3547_v41  ;;  %v728_v40 = vld [vmem:[%s4404_s24 + $0x790] sm:$0xff]  ;;  %v539_v41 = vld [vmem:[%s4404_s24 + $0x1a8] sm:$0xff]  ;;  %v3581_v45 = vpack.c.bf16 %v726_v38, %v662_v37  ;;  %v549_v38 = vld [vmem:[%s4404_s24 + $0x1f8] sm:$0xff] }
 0x194   : > { %3556 = vmatprep.subr.bf16.mxu1 %v3555_v42  ;;  %2206 = vmatprep.mubr.f32.mxu0 %v463_v43  ;;  %v603_v42 = vld [vmem:[%s4404_s24 + $0x3a8] sm:$0xff]  ;;  %v541_v43 = vld [vmem:[%s4404_s24 + $0x1b8] sm:$0xff]  ;;  %v3589_v46 = vpack.c.bf16 %v728_v40, %v664_v39 }
 0x195   : > { %2276 = vmatprep.mubr.f32.mxu1 %v465_v44  ;;  %v605_v44 = vld [vmem:[%s4404_s24 + $0x3b8] sm:$0xff]  ;;  %v3591_v47 = vpack.c.bf16 %v603_v42, %v539_v41 }
 0x196   : > { %v3599_v48 = vpack.c.bf16 %v605_v44, %v541_v43  ;;  %v613_v39 = vld [vmem:[%s4404_s24 + $0x3f8] sm:$0xff] }
 0x19a   : > { %3550 = vmatpush1.bf16.xpose.msra.mxu0 %v3549_v53  ;;  %v667_v53 = vld [vmem:[%s4404_s24 + $0x5a8] sm:$0xff] }
 0x19b   : > { %3558 = vmatpush1.bf16.xpose.msra.mxu1 %v3557_v54  ;;  %3560 = vmatprep.subr.bf16.mxu0 %v3559_v55  ;;  %v731_v54 = vld [vmem:[%s4404_s24 + $0x7a8] sm:$0xff]  ;;  %v669_v55 = vld [vmem:[%s4404_s24 + $0x5b8] sm:$0xff] }
 0x19c   : > { %3568 = vmatprep.subr.bf16.mxu1 %v3567_v56  ;;  %v733_v56 = vld [vmem:[%s4404_s24 + $0x7b8] sm:$0xff]  ;;  %v3595_v61 = vpack.c.bf16 %v731_v54, %v667_v53 }
 0x19d   : > { %v3603_v62 = vpack.c.bf16 %v733_v56, %v669_v55  ;;  %v741_v53 = vld [vmem:[%s4404_s24 + $0x7f8] sm:$0xff]  ;;  %v480_v56 = vld [vmem:[%s4394_s17 + $0x1d0] sm:$0xff] }
 0x19e   : > { %v478_v54 = vld [vmem:[%s4394_s17 + $0x1c0] sm:$0xff] }
 0x1a1   : > { %2207 = vmatmul.mubr.f32.vlgmr.msra.gmra.mrb[20].mxu0 %v462_v1  ;;  %v666_v1 = vld [vmem:[%s4404_s24 + $0x5a0] sm:$0xff] }
 0x1a2   : > { %3562 = vmatpush1.bf16.xpose.msra.mxu0 %v3561_v2  ;;  %2277 = vmatmul.mubr.f32.vlgmr.msra.gmra.mrb[20].mxu1 %v464_v3  ;;  %v730_v2 = vld [vmem:[%s4404_s24 + $0x7a0] sm:$0xff]  ;;  %v668_v3 = vld [vmem:[%s4404_s24 + $0x5b0] sm:$0xff] }
 0x1a3   : > { %3570 = vmatpush1.bf16.xpose.msra.mxu1 %v3569_v4  ;;  %3564 = vmatprep.subr.bf16.mxu0 %v3563_v5  ;;  %v732_v4 = vld [vmem:[%s4404_s24 + $0x7b0] sm:$0xff]  ;;  %v543_v5 = vld [vmem:[%s4404_s24 + $0x1c8] sm:$0xff]  ;;  %v3597_v9 = vpack.c.bf16 %v730_v2, %v666_v1 }
 0x1a4   : > { %3572 = vmatprep.subr.bf16.mxu1 %v3571_v6  ;;  %2346 = vmatprep.mubr.f32.mxu0 %v467_v7  ;;  %v607_v6 = vld [vmem:[%s4404_s24 + $0x3c8] sm:$0xff]  ;;  %v545_v7 = vld [vmem:[%s4404_s24 + $0x1d8] sm:$0xff]  ;;  %v3605_v10 = vpack.c.bf16 %v732_v4, %v668_v3  ;;  %v676_v1 = vld [vmem:[%s4404_s24 + $0x5f0] sm:$0xff] }
 0x1a5   : > { %2416 = vmatprep.mubr.f32.mxu1 %v469_v8  ;;  %v609_v8 = vld [vmem:[%s4404_s24 + $0x3d8] sm:$0xff]  ;;  %v3607_v11 = vpack.c.bf16 %v607_v6, %v543_v5  ;;  %v740_v2 = vld [vmem:[%s4404_s24 + $0x7f0] sm:$0xff] }
 0x1a6   : > { %v3615_v12 = vpack.c.bf16 %v609_v8, %v545_v7 }
 0x1aa   : > { %3566 = vmatpush1.bf16.xpose.msra.mxu0 %v3565_v17  ;;  %v671_v17 = vld [vmem:[%s4404_s24 + $0x5c8] sm:$0xff] }
 0x1ab   : > { %3574 = vmatpush1.bf16.xpose.msra.mxu1 %v3573_v18  ;;  %3576 = vmatprep.subr.bf16.mxu0 %v3575_v19  ;;  %v735_v18 = vld [vmem:[%s4404_s24 + $0x7c8] sm:$0xff]  ;;  %v673_v19 = vld [vmem:[%s4404_s24 + $0x5d8] sm:$0xff] }
 0x1ac   : > { %3584 = vmatprep.subr.bf16.mxu1 %v3583_v20  ;;  %v737_v20 = vld [vmem:[%s4404_s24 + $0x7d8] sm:$0xff]  ;;  %v3611_v25 = vpack.c.bf16 %v735_v18, %v671_v17 }
 0x1ad   : > { %v3619_v26 = vpack.c.bf16 %v737_v20, %v673_v19 }
 0x1b1   : > { %2347 = vmatmul.mubr.f32.vlgmr.msra.gmra.mrb[22].mxu0 %v466_v29  ;;  %v670_v29 = vld [vmem:[%s4404_s24 + $0x5c0] sm:$0xff] }
 0x1b2   : > { %3578 = vmatpush1.bf16.xpose.msra.mxu0 %v3577_v30  ;;  %2417 = vmatmul.mubr.f32.vlgmr.msra.gmra.mrb[22].mxu1 %v468_v31  ;;  %v734_v30 = vld [vmem:[%s4404_s24 + $0x7c0] sm:$0xff]  ;;  %v672_v31 = vld [vmem:[%s4404_s24 + $0x5d0] sm:$0xff] }
 0x1b3   : > { %3586 = vmatpush1.bf16.xpose.msra.mxu1 %v3585_v32  ;;  %3580 = vmatprep.subr.bf16.mxu0 %v3579_v33  ;;  %v736_v33 = vld [vmem:[%s4404_s24 + $0x7d0] sm:$0xff]  ;;  %v3613_v42 = vpack.c.bf16 %v734_v30, %v670_v29 }
 0x1b4   : > { %3588 = vmatprep.subr.bf16.mxu1 %v3587_v34  ;;  %2486 = vmatprep.mubr.f32.mxu0 %v471_v35  ;;  %v547_v34 = vld [vmem:[%s4404_s24 + $0x1e8] sm:$0xff]  ;;  %v3621_v43 = vpack.c.bf16 %v736_v33, %v672_v31 }
 0x1b5   : > { %2556 = vmatprep.mubr.f32.mxu1 %v473_v36  ;;  %v611_v35 = vld [vmem:[%s4404_s24 + $0x3e8] sm:$0xff] }
 0x1b6   : > { %v3623_v44 = vpack.c.bf16 %v611_v35, %v547_v34 }
 0x1ba   : > { %3582 = vmatpush1.bf16.xpose.msra.mxu0 %v3581_v45  ;;  %v3631_v45 = vpack.c.bf16 %v613_v39, %v549_v38 }
 0x1bb   : > { %3590 = vmatpush1.bf16.xpose.msra.mxu1 %v3589_v46  ;;  %3592 = vmatprep.subr.bf16.mxu0 %v3591_v47  ;;  %v546_v46 = vld [vmem:[%s4404_s24 + $0x1e0] sm:$0xff] }
 0x1bc   : > { %3600 = vmatprep.subr.bf16.mxu1 %v3599_v48  ;;  %v610_v47 = vld [vmem:[%s4404_s24 + $0x3e0] sm:$0xff]  ;;  %v548_v48 = vld [vmem:[%s4404_s24 + $0x1f0] sm:$0xff] }
 0x1bd   : > { %v3625_v55 = vpack.c.bf16 %v610_v47, %v546_v46 }
 0x1c1   : > { %2487 = vmatmul.mubr.f32.vlgmr.msra.gmra.mrb[24].mxu0 %v470_v57  ;;  %v3633_v57 = vpack.c.bf16 %v612_v49, %v548_v48 }
 0x1c2   : > { %3594 = vmatpush1.bf16.xpose.msra.mxu0 %v3593_v58  ;;  %2557 = vmatmul.mubr.f32.vlgmr.msra.gmra.mrb[24].mxu1 %v472_v59  ;;  %v3627_v58 = vpack.c.bf16 %v739_v51, %v675_v50  ;;  %v3635_v59 = vpack.c.bf16 %v741_v53, %v677_v52 }
 0x1c3   : > { %3602 = vmatpush1.bf16.xpose.msra.mxu1 %v3601_v60  ;;  %3596 = vmatprep.subr.bf16.mxu0 %v3595_v61  ;;  %v483_v60 = vld [vmem:[%s4394_s17 + $0x1e8] sm:$0xff]  ;;  %v485_v61 = vld [vmem:[%s4394_s17 + $0x1f8] sm:$0xff] }
 0x1c4   : > { %3604 = vmatprep.subr.bf16.mxu1 %v3603_v62  ;;  %2626 = vmatprep.mubr.f32.mxu0 %v475_v63  ;;  %v674_v62 = vld [vmem:[%s4404_s24 + $0x5e0] sm:$0xff] }
 0x1c5   : > { %2696 = vmatprep.mubr.f32.mxu1 %v477_v0  ;;  %v738_v63 = vld [vmem:[%s4404_s24 + $0x7e0] sm:$0xff] }
 0x1c6   : > { %v3629_v7 = vpack.c.bf16 %v738_v63, %v674_v62 }
 0x1ca   : > { %3598 = vmatpush1.bf16.xpose.msra.mxu0 %v3597_v9  ;;  %v3637_v9 = vpack.c.bf16 %v740_v2, %v676_v1 }
 0x1cb   : > { %3606 = vmatpush1.bf16.xpose.msra.mxu1 %v3605_v10  ;;  %3608 = vmatprep.subr.bf16.mxu0 %v3607_v11  ;;  %v482_v10 = vld [vmem:[%s4394_s17 + $0x1e0] sm:$0xff]  ;;  %v484_v11 = vld [vmem:[%s4394_s17 + $0x1f0] sm:$0xff] }
 0x1cc   : > { %3616 = vmatprep.subr.bf16.mxu1 %v3615_v12 }
 0x1d1   : > { %2627 = vmatmul.mubr.f32.vlgmr.msra.gmra.mrb[26].mxu0 %v474_v21 }
 0x1d2   : > { %3610 = vmatpush1.bf16.xpose.msra.mxu0 %v3609_v22  ;;  %2697 = vmatmul.mubr.f32.vlgmr.msra.gmra.mrb[26].mxu1 %v476_v23 }
 0x1d3   : > { %3618 = vmatpush1.bf16.xpose.msra.mxu1 %v3617_v24  ;;  %3612 = vmatprep.subr.bf16.mxu0 %v3611_v25 }
 0x1d4   : > { %v808_v32 = vpop.f32.mrb[0].mxu0  ;;  %3620 = vmatprep.subr.bf16.mxu1 %v3619_v26  ;;  %2766 = vmatprep.mubr.f32.mxu0 %v479_v27 }
 0x1d5   : > { %v810_v36 = vpop.f32.mrb[1].mxu0  ;;  %v878_v37 = vpop.f32.mrb[0].mxu1  ;;  %2836 = vmatprep.mubr.f32.mxu1 %v481_v28 }
 0x1d6   : > { %v879_v40 = vadd.f32 %v878_v37, %v808_v32  ;;  %v880_v41 = vpop.f32.mrb[1].mxu1 }
 0x1da   : > { %3614 = vmatpush1.bf16.xpose.msra.mxu0 %v3613_v42 }
 0x1db   : > { %3622 = vmatpush1.bf16.xpose.msra.mxu1 %v3621_v43  ;;  %3624 = vmatprep.subr.bf16.mxu0 %v3623_v44 }
 0x1dc   : > { %3632 = vmatprep.subr.bf16.mxu1 %v3631_v45 }
 0x1e1   : > { %2767 = vmatmul.mubr.f32.vlgmr.msra.gmra.mrb[28].mxu0 %v478_v54 }
 0x1e2   : > { %3626 = vmatpush1.bf16.xpose.msra.mxu0 %v3625_v55  ;;  %2837 = vmatmul.mubr.f32.vlgmr.msra.gmra.mrb[28].mxu1 %v480_v56 }
 0x1e3   : > { %3634 = vmatpush1.bf16.xpose.msra.mxu1 %v3633_v57  ;;  %3628 = vmatprep.subr.bf16.mxu0 %v3627_v58 }
 0x1e4   : > { %v948_v0 = vpop.f32.mrb[2].mxu0  ;;  %3636 = vmatprep.subr.bf16.mxu1 %v3635_v59  ;;  %2906 = vmatprep.mubr.f32.mxu0 %v483_v60 }
 0x1e5   : > { %v949_v3 = vadd.f32 %v948_v0, %v879_v40  ;;  %v950_v4 = vpop.f32.mrb[3].mxu0  ;;  %v1018_v5 = vpop.f32.mrb[2].mxu1  ;;  %2976 = vmatprep.mubr.f32.mxu1 %v485_v61 }
 0x1e6   : > { %v1020_v6 = vpop.f32.mrb[3].mxu1 }
 0x1e7   : > { %v1019_v8 = vadd.f32 %v1018_v5, %v949_v3 }
 0x1ea   : > { %3630 = vmatpush1.bf16.xpose.msra.mxu0 %v3629_v7 }
 0x1eb   : > { %3638 = vmatpush1.bf16.xpose.msra.mxu1 %v3637_v9 }
 0x1f1   : > { %2907 = vmatmul.mubr.f32.vlgmr.msra.gmra.mrb[30].mxu0 %v482_v10 }
 0x1f2   : > { %2977 = vmatmul.mubr.f32.vlgmr.msra.gmra.mrb[30].mxu1 %v484_v11 }
 0x1f4   : > { %v1088_v12 = vpop.f32.mrb[4].mxu0 }
 0x1f5   : > { %v1089_v13 = vadd.f32 %v1088_v12, %v1019_v8  ;;  %v1090_v14 = vpop.f32.mrb[5].mxu0  ;;  %v1158_v15 = vpop.f32.mrb[4].mxu1 }
 0x1f6   : > { %v1160_v16 = vpop.f32.mrb[5].mxu1 }
 0x1f7   : > { %v1159_v17 = vadd.f32 %v1158_v15, %v1089_v13 }
 0x204   : > { %v1228_v18 = vpop.f32.mrb[6].mxu0 }
 0x205   : > { %v1229_v19 = vadd.f32 %v1228_v18, %v1159_v17  ;;  %v1230_v20 = vpop.f32.mrb[7].mxu0  ;;  %v1298_v21 = vpop.f32.mrb[6].mxu1 }
 0x206   : > { %v1300_v22 = vpop.f32.mrb[7].mxu1 }
 0x207   : > { %v1299_v23 = vadd.f32 %v1298_v21, %v1229_v19 }
 0x214   : > { %v1368_v24 = vpop.f32.mrb[8].mxu0 }
 0x215   : > { %v1369_v25 = vadd.f32 %v1368_v24, %v1299_v23  ;;  %v1370_v26 = vpop.f32.mrb[9].mxu0  ;;  %v1438_v27 = vpop.f32.mrb[8].mxu1 }
 0x216   : > { %v1440_v28 = vpop.f32.mrb[9].mxu1 }
 0x217   : > { %v1439_v29 = vadd.f32 %v1438_v27, %v1369_v25 }
 0x224   : > { %v1508_v30 = vpop.f32.mrb[10].mxu0 }
 0x225   : > { %v1509_v31 = vadd.f32 %v1508_v30, %v1439_v29  ;;  %v1510_v32 = vpop.f32.mrb[11].mxu0  ;;  %v1578_v33 = vpop.f32.mrb[10].mxu1  ;;  %v421_v30 = vld [vmem:[#allocation2] sm:$0xff] }
 0x226   : > { %v1580_v34 = vpop.f32.mrb[11].mxu1 }
 0x227   : > { %v1579_v35 = vadd.f32 %v1578_v33, %v1509_v31  ;;  %v2991_v34 = vld [vmem:[#allocation9] sm:$0xff] (!%p3338_p7) }
 0x234   : > { %v1648_v36 = vpop.f32.mrb[12].mxu0 }
 0x235   : > { %v1649_v37 = vadd.f32 %v1648_v36, %v1579_v35  ;;  %v1650_v38 = vpop.f32.mrb[13].mxu0  ;;  %v1718_v39 = vpop.f32.mrb[12].mxu1  ;;  %v2992_v35 = vld [vmem:[#allocation9 + $0x8] sm:$0xff] (!%p3338_p7)  ;;  %v2993_v36 = vld [vmem:[#allocation9 + $0x10] sm:$0xff] (!%p3338_p7) }
 0x236   : > { %v1720_v40 = vpop.f32.mrb[13].mxu1  ;;  %v3640_v38 = vpack.c.bf16 (!%p3338_p7), %v2992_v35, %v2991_v34 }
 0x237   : > { %v1719_v41 = vadd.f32 %v1718_v39, %v1649_v37  ;;  %v4099_v37 = vmov (!%p3338_p7), 0.0|0.0   ;;  %v2994_v39 = vld [vmem:[#allocation9 + $0x18] sm:$0xff] (!%p3338_p7)  ;;  %v4101_v40 = vmov (!%p3338_p7), 0.0  }
 0x238   : > { %3639 = vmatprep.subr.bf16.mxu0 (!%p3338_p7), %v4099_v37  ;;  %3369 = vmatprep.mubr.msk.f32.mxu0 (!%p3338_p7), %vm4100_vm2, %v4101_v40 }
 0x239   : > { %3645 = vmatprep.subr.bf16.mxu1 (!%p3338_p7), %v4099_v37  ;;  %3380 = vmatprep.mubr.msk.f32.mxu1 (!%p3338_p7), %vm4100_vm2, %v4101_v40 }
 0x23a   : > { %3641 = vmatpush3.bf16.msra.mxu0 (!%p3338_p7), %v3640_v38 }
 0x23b   : > { %3642 = vmatprep.subr.bf16.mxu0 (!%p3338_p7), %v4099_v37 }
 0x244   : > { %v1788_v42 = vpop.f32.mrb[14].mxu0 }
 0x245   : > { %v1789_v43 = vadd.f32 %v1788_v42, %v1719_v41  ;;  %v1790_v44 = vpop.f32.mrb[15].mxu0  ;;  %v1858_v45 = vpop.f32.mrb[14].mxu1  ;;  %v3643_v41 = vpack.c.bf16 (!%p3338_p7), %v2994_v39, %v2993_v36  ;;  %v2990_v42 = vld [vmem:[#allocation6] sm:$0xff] (!%p3338_p7) }
 0x246   : > { %v1860_v46 = vpop.f32.mrb[15].mxu1  ;;  %v3079_v44 = vld [vmem:[#allocation12 + $0x8] sm:$0xff] (!%p3338_p7) }
 0x247   : > { %v1859_v47 = vadd.f32 %v1858_v45, %v1789_v43  ;;  %3644 = vmatpush3.bf16.msra.mxu0 (!%p3338_p7), %v3643_v41  ;;  %v3078_v43 = vld [vmem:[#allocation12] sm:$0xff] (!%p3338_p7)  ;;  %v3080_v46 = vld [vmem:[#allocation12 + $0x10] sm:$0xff] (!%p3338_p7) }
 0x248   : > { %v3646_v45 = vpack.c.bf16 (!%p3338_p7), %v3079_v44, %v3078_v43 }
 0x24a   : > { %3370 = vmatmul.mubr.msk.f32.vlgmr.msra.gmra.mrb[0].mxu0 (!%p3338_p7), %vm2983_vm1, %v2990_v42  ;;  %3647 = vmatpush3.bf16.msra.mxu1 (!%p3338_p7), %v3646_v45 }
 0x24b   : > { %3648 = vmatprep.subr.bf16.mxu1 (!%p3338_p7), %v4099_v37 }
 0x254   : > { %v1928_v48 = vpop.f32.mrb[16].mxu0 }
 0x255   : > { %v1929_v49 = vadd.f32 %v1928_v48, %v1859_v47  ;;  %v1930_v50 = vpop.f32.mrb[17].mxu0  ;;  %v1998_v51 = vpop.f32.mrb[16].mxu1  ;;  %v3081_v47 = vld [vmem:[#allocation12 + $0x18] sm:$0xff] (!%p3338_p7) }
 0x256   : > { %v2000_v52 = vpop.f32.mrb[17].mxu1  ;;  %v3649_v48 = vpack.c.bf16 (!%p3338_p7), %v3081_v47, %v3080_v46 }
 0x257   : > { %v1999_v53 = vadd.f32 %v1998_v51, %v1929_v49  ;;  %v3340_v51 = vld [vmem:[#allocation10] ss:$0 sm:$0xff] (!%p3338_p7) }
 0x258   : > { %3650 = vmatpush3.bf16.msra.mxu1 (!%p3338_p7), %v3649_v48 }
 0x264   : > { %v2068_v54 = vpop.f32.mrb[18].mxu0 }
 0x265   : > { %v2069_v55 = vadd.f32 %v2068_v54, %v1999_v53  ;;  %v2070_v56 = vpop.f32.mrb[19].mxu0  ;;  %v2138_v57 = vpop.f32.mrb[18].mxu1 }
 0x266   : > { %v2140_v58 = vpop.f32.mrb[19].mxu1  ;;  %v3341_v56 = vld [vmem:[#allocation13] ss:$0 sm:$0xff] (!%p3338_p7) }
 0x267   : > { %v2139_v59 = vadd.f32 %v2138_v57, %v2069_v55 }
 0x274   : > { %v2208_v60 = vpop.f32.mrb[20].mxu0 }
 0x275   : > { %v2209_v61 = vadd.f32 %v2208_v60, %v2139_v59  ;;  %v2210_v62 = vpop.f32.mrb[21].mxu0  ;;  %v2278_v63 = vpop.f32.mrb[20].mxu1 }
 0x276   : > { %v2280_v0 = vpop.f32.mrb[21].mxu1 }
 0x277   : > { %v2279_v1 = vadd.f32 %v2278_v63, %v2209_v61 }
 0x284   : > { %v2348_v2 = vpop.f32.mrb[22].mxu0 }
 0x285   : > { %v2349_v3 = vadd.f32 %v2348_v2, %v2279_v1  ;;  %v2350_v4 = vpop.f32.mrb[23].mxu0  ;;  %v2418_v5 = vpop.f32.mrb[22].mxu1 }
 0x286   : > { %v2420_v6 = vpop.f32.mrb[23].mxu1 }
 0x287   : > { %v2419_v7 = vadd.f32 %v2418_v5, %v2349_v3 }
 0x294   : > { %v2488_v8 = vpop.f32.mrb[24].mxu0 }
 0x295   : > { %v2489_v9 = vadd.f32 %v2488_v8, %v2419_v7  ;;  %v2490_v10 = vpop.f32.mrb[25].mxu0  ;;  %v2558_v11 = vpop.f32.mrb[24].mxu1 }
 0x296   : > { %v2560_v12 = vpop.f32.mrb[25].mxu1 }
 0x297   : > { %v2559_v13 = vadd.f32 %v2558_v11, %v2489_v9 }
 0x2a4   : > { %v2628_v14 = vpop.f32.mrb[26].mxu0 }
 0x2a5   : > { %v2629_v15 = vadd.f32 %v2628_v14, %v2559_v13  ;;  %v2630_v16 = vpop.f32.mrb[27].mxu0  ;;  %v2698_v17 = vpop.f32.mrb[26].mxu1 }
 0x2a6   : > { %v2700_v18 = vpop.f32.mrb[27].mxu1 }
 0x2a7   : > { %v2699_v19 = vadd.f32 %v2698_v17, %v2629_v15 }
 0x2b4   : > { %v2768_v20 = vpop.f32.mrb[28].mxu0 }
 0x2b5   : > { %v2769_v21 = vadd.f32 %v2768_v20, %v2699_v19  ;;  %v2770_v22 = vpop.f32.mrb[29].mxu0  ;;  %v2838_v23 = vpop.f32.mrb[28].mxu1 }
 0x2b6   : > { %v2840_v24 = vpop.f32.mrb[29].mxu1 }
 0x2b7   : > { %v2839_v25 = vadd.f32 %v2838_v23, %v2769_v21 }
 0x2c4   : > { %v2908_v26 = vpop.f32.mrb[30].mxu0 }
 0x2c5   : > { %v2909_v27 = vadd.f32 %v2908_v26, %v2839_v25  ;;  %v2910_v28 = vpop.f32.mrb[31].mxu0  ;;  %v2978_v29 = vpop.f32.mrb[30].mxu1  ;;  %2988 = sbr.rel (%p3338_p7) target bundleno = 1134 (0x46e), region = 84 }
 0x2c6   : > { %v2980_v31 = vpop.f32.mrb[31].mxu1 }
 0x2c7   : > { %v2979_v32 = vadd.f32 %v2978_v29, %v2909_v27 }
 0x2c9   : > { %v2982_v33 = vadd.f32 %v2979_v32, %v421_v30 }
 0x2cb   : > { %2984 = vst.msk [vmem:[#allocation2] sm:$0xff] %vm2983_vm1, %v2982_v33 }
 0x2d2   : > { %v2989_v49 = vld [vmem:[#allocation2] sm:$0xff] }
 0x31d   : > { %v3064_v50 = vpop.f32.mrb[0].mxu0 }
 0x31e   : > { %v3068_v52 = vadd.f32 %v3064_v50, %v2989_v49  ;;  %v3371_v53 = vpop.f32.mrb[1].mxu0 }
 0x320   : > { %v3076_v54 = vadd.f32 %v3340_v51, %v3068_v52 }
 0x322   : > { %v3077_v55 = vmax.f32 %v3076_v54, 0.0 }
 0x324   : > { %3381 = vmatmul.mubr.msk.f32.vlgmr.msra.gmra.mrb[0].mxu1 %vm2983_vm1, %v3077_v55 }
 0x3f7   : > { %v3158_v57 = vpop.f32.mrb[0].mxu1 }
 0x3f8   : > { %v3159_v58 = vadd.f32 %v3341_v56, %v3158_v57  ;;  %v3382_v59 = vpop.f32.mrb[1].mxu1 }
 0x3fa   : > { %3162 = vst.msk [vmem:[#allocation15] sm:$0xff] %vm2983_vm1, %v3159_v58  ;;  %3164 = vrot.lane.b32.xlu0 %v3159_v58, %s4102_s16 }
 0x46c   : > { %v3165_v60 = vpop.permute.xlu0 %3164 }
 0x46d   : > { %3167 = vst.msk [vmem:[#allocation16] sm:$0xff] %vm2983_vm1, %v3165_v60 }
 0x46e PF: > { %p3717_p4 = scmp.eq.s32.totalorder %s4171_s11, 1  ;;  %s4103_s20 = smov [#allocation15]  }
 0x46f   : > { %s3175_s10 = sshll.u32 %s4103_s20, 4  ;;  %s4104_s26 = smov [#allocation16]   ;;  %s3176_s10 = int_to_ptr.vmem [resolvable:$true] %s3175_s10 }
 0x470   : > { %s3186_s21 = sshll.u32 %s4104_s26, 4  ;;  %s3970_s23 = scalar_lea.vmem %s3176_s10, 128  ;;  %s3187_s21 = int_to_ptr.vmem [resolvable:$true] %s3186_s21 }
 0x471   : > { %p3971_p10 = scmp.ne.s32.totalorder %s3176_s10, %s3970_s23  ;;  %p3977_p0 = scmp.lt.s32.totalorder %s3176_s10, %s3176_s10 }
 0x472   : > { %p3978_p2 = scmp.lt.s32.totalorder %s3970_s23, %s3970_s23 }
 0x473   : > { %p3972_p13 = pnand %p3971_p10, %p3717_p4 }
 0x474   : > { %p3979_p5 = por %p3978_p2, %p3977_p0 }
 0x475   : > { %p3973_p11 = pneg %p3972_p13 }
 0x477   : > { %p3980_p9 = pnand %p3979_p5, %p3973_p11 }
 0x479   : > { %3983 = shalt.err (!%p3980_p9)
}
 0x47a   : > { %s3984_s15 = scalar_lea.hbm %s4815_s7, 128 }
 0x47b   : > { %p3985_p6 = scmp.ne.s32.totalorder %s4815_s7, %s3984_s15  ;;  %p3990_p8 = scmp.lt.u32.totalorder %s3984_s15, %s4815_s7 }
 0x47d   : > { %p3986_p3 = pnand %p3985_p6, %p3717_p4 }
 0x47f   : > { %p3987_p1 = pneg %p3986_p3 }
 0x481   : > { %p3992_p12 = pnand %p3990_p8, %p3987_p1 }
 0x483   : > { %3995 = shalt.err (!%p3992_p12)
}
 0x484   : > { %3676 = dma.vmem_to_hbm [thread:$0]  (%p3717_p4), %s3176_s10, 128, %s4815_s7, [#allocation5]  }
 0x485   : > { %s3996_s14 = scalar_lea.vmem %s3187_s21, 128  ;;  %p4003_p11 = scmp.lt.s32.totalorder %s3187_s21, %s3187_s21 }
 0x486   : > { %p3997_p7 = scmp.ne.s32.totalorder %s3187_s21, %s3996_s14  ;;  %p4004_p0 = scmp.lt.s32.totalorder %s3996_s14, %s3996_s14 }
 0x488   : > { %p3998_p10 = pnand %p3997_p7, %p3717_p4  ;;  %p4005_p2 = por %p4004_p0, %p4003_p11 }
 0x48a   : > { %p3999_p13 = pneg %p3998_p10 }
 0x48c   : > { %p4006_p5 = pnand %p4005_p2, %p3999_p13 }
 0x48e   : > { %4009 = shalt.err (!%p4006_p5)
}
 0x48f   : > { %s4860_s22 = sld [smem:[#allocation32_spill]] }
 0x495   : > { %s4010_s30 = scalar_lea.hbm %s4860_s22, 128 }
 0x496   : > { %p4011_p9 = scmp.ne.s32.totalorder %s4860_s22, %s4010_s30  ;;  %p4016_p1 = scmp.lt.u32.totalorder %s4010_s30, %s4860_s22 }
 0x498   : > { %p4012_p6 = pnand %p4011_p9, %p3717_p4 }
 0x49a   : > { %p4013_p3 = pneg %p4012_p6 }
 0x49c   : > { %p4018_p8 = pnand %p4016_p1, %p4013_p3 }
 0x49e   : > { %4021 = shalt.err (!%p4018_p8)
}
 0x49f   : > { %3678 = dma.vmem_to_hbm [thread:$0]  (%p3717_p4), %s3187_s21, 128, %s4860_s22, [#allocation17]  }
 0x4a0   : > { %4063 = dma.done.wait (%p3717_p4), [#allocation5], 128  }
 0x4a1   : > { %4065 = vsyncadd (%p3717_p4), [#allocation5], 4294967168 }
 0x4a2   : > { %4067 = dma.done.wait (%p3717_p4), [#allocation17], 128  }
 0x4a3   : > { %4069 = vsyncadd (%p3717_p4), [#allocation17], 4294967168 }
 0x4a4 PF: > { %s4861_s30 = sld [smem:[#allocation27_spill]]  ;;  %s4862_s10 = sld [smem:[#allocation26_spill]] }
 0x4a5   : > { %s4863_s29 = sld [smem:[#allocation28_spill]]  ;;  %s4864_s27 = smov %s4076_s28 }
 0x4aa   : > { %p24_p12 = scmp.ge.s32.totalorder %s4861_s30, 4   ;;  %s4865_s28 = smov %s4862_s10 }
 0x4ac   :  { %26 = sbr.rel (!%p24_p12) target bundleno = 13 (0xd), region = 132 }
 0x4b3   :  { %3203 = vsyncpa [#allocation4], 1 }
 0x4b4   :  { %3205 = vsyncpa [#allocation4 + $0x1], 1 }
 0x4b5   :  { %3206 = vsyncpa [#allocation7], 1 }
 0x4b6   :  { %3207 = vsyncpa [#allocation11], 1 }
 0x4b7   :  { %3208 = vsyncpa [#allocation14], 1 }
 0x4b8   :  { %3209 = vsyncpa [#allocation5], 1 }
 0x4b9   :  { %3211 = vsyncpa [#allocation5 + $0x1], 1 }
 0x4ba   :  { %3212 = vsyncpa [#allocation17], 1 }

</bundles_post_ra>
